<compile_context>
chip_gen: v7x
topology: tpu7x:2x2x1
jax: 0.10.0
libtpu: 0.0.40
codegen_flags: <defaults>
</compile_context>

<pallas_src>
from functools import partial

import jax
import jax.numpy as jnp
from jax.experimental import pallas as pl
from jax.experimental.pallas import tpu as pltpu


def _rup(x, m):
    return (x + m - 1) // m * m


# --------------------------------------------------------------------------------------
# Kernel: one grid step == one RecurrentMemory.forward() call (seq_len == 1).
# Grid axis t ("arbitrary") chains T calls; weights stay VMEM-resident across steps.
# --------------------------------------------------------------------------------------
def recurrent_memory_kernel(x_ref, mem_ref, st_ref, wb_ref, wf_ref, ow_ref, ob_ref,
                            logp_ref, hout_ref, h_s, cg_s, cl_s,
                            *, Hp, offs_b, offs_f, cdt):
    """x_ref : (1, B, Ep)   relu-able token embedding of step t (f32)
       mem_ref: (B, M, 2Hp) [m_embedding | c_embedding](memory)  (f32, resident)
       st_ref : (3, B, Hp)  [context | rmn_hidden | cell]        (f32, resident)
       wb_ref : packed MXU weight slab (bf16 or f32, resident)
       wf_ref : packed f32 bias / attention slab (resident)
       ow_ref : (2Hp, Vp) output head weight ([mb rows | ctx rows])
       ob_ref : (1, Vp)   output head bias (-1e30 in padded vocab lanes)
       logp_ref: (1, B, Vp) per-step log-softmax ; hout_ref: (B, Hp) lstm_hidden
       scratch: h_s (B,Hp) hidden carry, cg_s (B,4Hp) ctx gate contrib,
                cl_s (B,Vp) ctx logits contrib (+ bias)."""
    f32 = jnp.float32
    t = pl.program_id(0)

    def wgt(name):                       # bf16/f32 matmul weight section
        r, nr, nc = offs_b[name]
        return wb_ref[r:r + nr, 0:nc]

    def par(name):                       # f32 bias / small-matrix section
        r, nr, nc = offs_f[name]
        return wf_ref[r:r + nr, 0:nc]

    ctx = st_ref[0]                      # (B, Hp) constant across steps
    c0 = st_ref[2]                       # cell: module returns it unchanged -> constant

    # ---- step-invariant contributions: computed once at t == 0, kept in scratch ----
    @pl.when(t == 0)
    def _init():
        h_s[...] = st_ref[1]             # initial rmn_hidden
        ctx_c = ctx.astype(cdt)
        cg_s[...] = (jnp.dot(ctx_c, wgt("lstm_wc"), preferred_element_type=f32)
                     + par("lstm_b"))
        cl_s[...] = (jnp.dot(ctx_c, ow_ref[Hp:2 * Hp, :], preferred_element_type=f32)
                     + ob_ref[...])

    # ---- LSTM cell: gates = relu(x) @ Wx + h @ Wh + (ctx @ Wc + b) ----
    x = jnp.maximum(x_ref[0], 0.0)                         # F.relu on embedding (f32)
    h0 = h_s[...]
    gates = (jnp.dot(x.astype(cdt), wgt("lstm_wx"), preferred_element_type=f32)
             + jnp.dot(h0.astype(cdt), wgt("lstm_wh"), preferred_element_type=f32)
             + cg_s[...])
    i_g = jax.nn.sigmoid(gates[:, 0 * Hp:1 * Hp])
    f_g = jax.nn.sigmoid(gates[:, 1 * Hp:2 * Hp])
    g_g = jnp.tanh(gates[:, 2 * Hp:3 * Hp])
    o_g = jax.nn.sigmoid(gates[:, 3 * Hp:4 * Hp])
    c1 = f_g * c0 + i_g * g_g
    h1 = o_g * jnp.tanh(c1)                                # lstm_hidden (B, Hp)

    # ---- memory attention, (B, M) orientation (row bias, LogSoftmax over M) ----
    mem_in = mem_ref[:, :, 0:Hp]                           # (B, M, Hp)
    mem_out = mem_ref[:, :, Hp:2 * Hp]
    scores = jnp.sum(mem_in * h1[:, None, :], axis=2)      # (B, M)
    attn = jnp.dot(scores, par("attn_w"), preferred_element_type=f32) + par("attn_b")
    attn = attn - jnp.max(attn, axis=1, keepdims=True)
    attn = attn - jnp.log(jnp.sum(jnp.exp(attn), axis=1, keepdims=True))   # log-softmax
    mctx = jnp.sum(mem_out * attn[:, :, None], axis=1)     # (B, Hp) memory_context

    # ---- GRU cell (seq_len == 1), hidden initialised with lstm_hidden ----
    gi = jnp.dot(mctx.astype(cdt), wgt("gru_wi"), preferred_element_type=f32) + par("gru_bi")
    gh = jnp.dot(h1.astype(cdt), wgt("gru_wh"), preferred_element_type=f32) + par("gru_bh")
    r_g = jax.nn.sigmoid(gi[:, 0 * Hp:1 * Hp] + gh[:, 0 * Hp:1 * Hp])
    z_g = jax.nn.sigmoid(gi[:, 1 * Hp:2 * Hp] + gh[:, 1 * Hp:2 * Hp])
    n_g = jnp.tanh(gi[:, 2 * Hp:3 * Hp] + r_g * gh[:, 2 * Hp:3 * Hp])
    mb = (1.0 - z_g) * n_g + z_g * h1                      # mb_output[0]

    # ---- output head: mb @ W_mb + (ctx @ W_ctx + b), log-softmax (no lane concat) ----
    logits = jnp.dot(mb.astype(cdt), ow_ref[0:Hp, :], preferred_element_type=f32) + cl_s[...]
    logits = logits - jnp.max(logits, axis=-1, keepdims=True)
    logp_ref[0] = logits - jnp.log(jnp.sum(jnp.exp(logits), axis=-1, keepdims=True))

    h_s[...] = h1                                          # hidden carry for step t+1
    hout_ref[...] = h1                                     # lane-dense (B, Hp) output


# --------------------------------------------------------------------------------------
# Parameters: torch-equivalent raw params + one-time packing
# --------------------------------------------------------------------------------------
def init_params(key, hidden_size, output_size, memory_size, embed_dim=100):
    H, V, M, E = hidden_size, output_size, memory_size, embed_dim
    ks = jax.random.split(key, 16)

    def uni(k, shape, fan):
        b = 1.0 / jnp.sqrt(fan)
        return jax.random.uniform(k, shape, jnp.float32, -b, b)

    return {
        "hidden_size": H,
        "embedding":   jax.random.normal(ks[0], (V, E), jnp.float32),
        "m_embedding": jax.random.normal(ks[1], (V, H), jnp.float32),
        "c_embedding": jax.random.normal(ks[2], (V, H), jnp.float32),
        "lstm_w_ih": uni(ks[3], (4 * H, E + H), H),
        "lstm_w_hh": uni(ks[4], (4 * H, H), H),
        "lstm_b_ih": uni(ks[5], (4 * H,), H),
        "lstm_b_hh": uni(ks[6], (4 * H,), H),
        "attn_w": uni(ks[7], (M, M), M),
        "attn_b": uni(ks[8], (M,), M),
        "gru_w_ih": uni(ks[9], (3 * H, H), H),
        "gru_w_hh": uni(ks[10], (3 * H, H), H),
        "gru_b_ih": uni(ks[11], (3 * H,), H),
        "gru_b_hh": uni(ks[12], (3 * H,), H),
        "out_w": uni(ks[13], (V, 2 * H), 2 * H),
        "out_b": uni(ks[14], (V,), 2 * H),
    }


def pack_params(params, weights_dtype=jnp.bfloat16):
    """One-time packing: 128-padded, gate-block-aligned matmul weights in a bf16 slab,
    f32 biases/attention in a small f32 slab, and a separate lane-dense output head."""
    f32 = jnp.float32
    H = params["hidden_size"]
    V, E = params["embedding"].shape
    M = params["attn_w"].shape[0]
    Hp, Ep, Vp = _rup(H, 128), _rup(E, 128), _rup(V, 128)

    def pad_gate_cols(w, n_gates):
        # (K, n_gates*H) -> (K, n_gates*Hp), gate g lands at lanes [g*Hp, g*Hp+H)
        out = jnp.zeros((w.shape[0], n_gates * Hp), f32)
        for g in range(n_gates):
            out = out.at[:, g * Hp:g * Hp + H].set(w[:, g * H:(g + 1) * H])
        return out

    def pad_rows(w, rows):
        return jnp.zeros((rows, w.shape[1]), f32).at[:w.shape[0]].set(w)

    # LSTM: W_ih (4H, E+H) split into embedding part and ctx part; W_hh (4H, H)
    w_ih_t = params["lstm_w_ih"].T                                      # (E+H, 4H)
    lstm_wx = pad_rows(pad_gate_cols(w_ih_t[:E], 4), Ep)                # (Ep, 4Hp)
    lstm_wc = pad_rows(pad_gate_cols(w_ih_t[E:E + H], 4), Hp)           # (Hp, 4Hp)
    lstm_wh = pad_rows(pad_gate_cols(params["lstm_w_hh"].T, 4), Hp)     # (Hp, 4Hp)
    lstm_b = pad_gate_cols((params["lstm_b_ih"] + params["lstm_b_hh"]).reshape(1, -1), 4)

    gru_wi = pad_rows(pad_gate_cols(params["gru_w_ih"].T, 3), Hp)       # (Hp, 3Hp)
    gru_wh = pad_rows(pad_gate_cols(params["gru_w_hh"].T, 3), Hp)
    gru_bi = pad_gate_cols(params["gru_b_ih"].reshape(1, -1), 3)
    gru_bh = pad_gate_cols(params["gru_b_hh"].reshape(1, -1), 3)

    attn_wt = params["attn_w"].T                                        # (M, M): scores @ W.T
    attn_b = params["attn_b"].reshape(1, -1)                            # (1, M) row bias

    # Output head: its own lane-dense slab (never forces Vp lanes on the rest).
    out_wt = params["out_w"].T                                          # (2H, V): [mb | ctx] rows
    ow = jnp.zeros((2 * Hp, Vp), f32)
    ow = ow.at[0:H, 0:V].set(out_wt[0:H])
    ow = ow.at[Hp:Hp + H, 0:V].set(out_wt[H:2 * H])
    ob = jnp.full((1, Vp), -1e30, f32).at[0, 0:V].set(params["out_b"])  # f32 (exact softmax)

    def build_slab(sections, dtype):
        lanes = max(int(a.shape[1]) for _, a in sections)
        offs, row = {}, 0
        for name, a in sections:
            row = _rup(row, 16)
            offs[name] = (row, int(a.shape[0]), int(a.shape[1]))        # static python ints
            row += int(a.shape[0])
        slab = jnp.zeros((_rup(row, 16), lanes), f32)
        for name, a in sections:
            r, nr, nc = offs[name]
            slab = slab.at[r:r + nr, 0:nc].set(a)
        return slab.astype(dtype), offs

    wb_slab, offs_b = build_slab(
        [("lstm_wx", lstm_wx), ("lstm_wc", lstm_wc), ("lstm_wh", lstm_wh),
         ("gru_wi", gru_wi), ("gru_wh", gru_wh)], weights_dtype)
    wf_slab, offs_f = build_slab(
        [("lstm_b", lstm_b), ("gru_bi", gru_bi), ("gru_bh", gru_bh),
         ("attn_w", attn_wt), ("attn_b", attn_b)], f32)

    emb = jnp.zeros((V, Ep), f32).at[:, :E].set(params["embedding"])    # padded token table
    mc = jnp.zeros((V, 2 * Hp), f32)                                    # fused memory table
    mc = mc.at[:, 0:H].set(params["m_embedding"])
    mc = mc.at[:, Hp:Hp + H].set(params["c_embedding"])

    return {
        "emb": emb, "mc_table": mc,
        "wb": wb_slab, "offs_b": offs_b, "wf": wf_slab, "offs_f": offs_f,
        "ow": ow.astype(weights_dtype), "ob": ob,
        "compute_dtype": weights_dtype,
        "dims": dict(H=H, Hp=Hp, E=E, Ep=Ep, V=V, Vp=Vp, M=M),
    }


# --------------------------------------------------------------------------------------
# Fused T-step driver (single pallas_call) + module-faithful wrappers
# --------------------------------------------------------------------------------------
def _fused_forward(packed, tokens, h0, c0, ctx, memory_tensor):
    """tokens (T,B) int32; h0/c0/ctx (B,H); memory_tensor (M,B) int32.
       Returns (log_probs (T,B,V), final lstm_hidden (B,H))."""
    d = packed["dims"]
    H, Hp, Ep, V, Vp, M = d["H"], d["Hp"], d["Ep"], d["V"], d["Vp"], d["M"]
    T, B = tokens.shape

    # glue: one-time gathers / padding (per call, not per step)
    x_emb = packed["emb"][tokens]                             # (T, B, Ep)
    mem = packed["mc_table"][memory_tensor.T]                 # (B, M, 2Hp)
    state0 = jnp.zeros((3, B, Hp), jnp.float32)
    state0 = state0.at[0, :, :H].set(ctx).at[1, :, :H].set(h0).at[2, :, :H].set(c0)

    wb_slab, wf_slab, ow, ob = packed["wb"], packed["wf"], packed["ow"], packed["ob"]
    kern = partial(recurrent_memory_kernel, Hp=Hp,
                   offs_b=packed["offs_b"], offs_f=packed["offs_f"],
                   cdt=packed["compute_dtype"])

    logp, hout = pl.pallas_call(
        kern,
        out_shape=(jax.ShapeDtypeStruct((T, B, Vp), jnp.float32),   # per-step log-softmax
                   jax.ShapeDtypeStruct((B, Hp), jnp.float32)),     # final lstm_hidden
        grid=(T,),
        in_specs=[
            pl.BlockSpec((1, B, Ep), lambda t: (t, 0, 0)),          # per-step token embedding
            pl.BlockSpec((B, M, 2 * Hp), lambda t: (0, 0, 0)),      # memory (resident)
            pl.BlockSpec((3, B, Hp), lambda t: (0, 0, 0)),          # [ctx | h0 | cell] (resident)
            pl.BlockSpec(wb_slab.shape, lambda t: (0, 0)),          # matmul weights (resident)
            pl.BlockSpec(wf_slab.shape, lambda t: (0, 0)),          # biases / attention (resident)
            pl.BlockSpec(ow.shape, lambda t: (0, 0)),               # output head weight (resident)
            pl.BlockSpec(ob.shape, lambda t: (0, 0)),               # output head bias (resident)
        ],
        out_specs=(
            pl.BlockSpec((1, B, Vp), lambda t: (t, 0, 0)),
            pl.BlockSpec((B, Hp), lambda t: (0, 0)),
        ),
        scratch_shapes=[
            pltpu.VMEM((B, Hp), jnp.float32),        # hidden carry
            pltpu.VMEM((B, 4 * Hp), jnp.float32),    # ctx contribution to LSTM gates
            pltpu.VMEM((B, Vp), jnp.float32),        # ctx contribution to logits (+ bias)
        ],
        compiler_params=pltpu.CompilerParams(
            dimension_semantics=("arbitrary",),       # time axis carries state
            vmem_limit_bytes=32 * 1024 * 1024),
    )(x_emb, mem, state0, wb_slab, wf_slab, ow, ob)

    return logp[:, :, :V], hout[:, :H]


def recurrent_memory_forward(packed, inp, rmn_hidden, cell, context,
                             batch_size, memory_tensor, memory_size):
    """Single step; mirrors RecurrentMemory.forward exactly.  inp: (1,B) int32.
       Returns (log_probs (B,V), lstm_hidden (1,B,H), cell)."""
    H = packed["dims"]["H"]
    B = batch_size
    logp, h1 = _fused_forward(packed, inp, rmn_hidden[0], cell[0],
                              context.reshape(-1, B, H)[0], memory_tensor)
    return logp[0], h1.reshape(1, B, H), cell     # module returns the input cell unchanged


def recurrent_memory_forward_seq(packed, inp_seq, rmn_hidden, cell, context,
                                 batch_size, memory_tensor, memory_size):
    """T chained module calls fused into ONE pallas_call: each step feeds the
       returned (lstm_hidden, cell) back into the next call.  inp_seq: (T,B).
       Returns (log_probs (T,B,V), final lstm_hidden (1,B,H), cell)."""
    H = packed["dims"]["H"]
    B = batch_size
    logp, h1 = _fused_forward(packed, inp_seq, rmn_hidden[0], cell[0],
                              context.reshape(-1, B, H)[0], memory_tensor)
    return logp, h1.reshape(1, B, H), cell


# --------------------------------------------------------------------------------------
# Pure-JAX reference of the PyTorch forward (sanity check)
# --------------------------------------------------------------------------------------
def reference_forward(params, inp, rmn_hidden, cell, context,
                      batch_size, memory_tensor, memory_size):
    H = params["hidden_size"]
    B = batch_size

    x = jax.nn.relu(params["embedding"][inp[0]])               # (B, E)
    ctx = context.reshape(1, B, H)[0]
    h0, c0 = rmn_hidden[0], cell[0]

    xcat = jnp.concatenate([x, ctx], axis=1)                   # (B, E+H)
    gates = (xcat @ params["lstm_w_ih"].T + params["lstm_b_ih"]
             + h0 @ params["lstm_w_hh"].T + params["lstm_b_hh"])
    i = jax.nn.sigmoid(gates[:, :H]); f = jax.nn.sigmoid(gates[:, H:2 * H])
    g = jnp.tanh(gates[:, 2 * H:3 * H]); o = jax.nn.sigmoid(gates[:, 3 * H:])
    c1 = f * c0 + i * g
    h1 = o * jnp.tanh(c1)

    mem_in = params["m_embedding"][memory_tensor]              # (M, B, H)
    mem_out = params["c_embedding"][memory_tensor]
    scores = jnp.einsum("bmh,bh->bm", jnp.transpose(mem_in, (1, 0, 2)), h1)
    attn = scores @ params["attn_w"].T + params["attn_b"]
    attn_dist = jax.nn.log_softmax(attn, axis=1)
    mctx = jnp.einsum("bmh,bm->bh", jnp.transpose(mem_out, (1, 0, 2)), attn_dist)

    gi = mctx @ params["gru_w_ih"].T + params["gru_b_ih"]
    gh = h1 @ params["gru_w_hh"].T + params["gru_b_hh"]
    r = jax.nn.sigmoid(gi[:, :H] + gh[:, :H])
    z = jax.nn.sigmoid(gi[:, H:2 * H] + gh[:, H:2 * H])
    n = jnp.tanh(gi[:, 2 * H:] + r * gh[:, 2 * H:])
    mb = (1.0 - z) * n + z * h1

    logits = jnp.concatenate([mb, ctx], axis=1) @ params["out_w"].T + params["out_b"]
    return jax.nn.log_softmax(logits, axis=1), h1.reshape(1, B, H), cell


if __name__ == "__main__":
    H, V, M, B, E, T = 32, 64, 16, 8, 100, 4
    n_layers = 1

    key = jax.random.PRNGKey(0)
    kp, k1, k2, k3, k4, k5 = jax.random.split(key, 6)
    params = init_params(kp, H, V, M, embed_dim=E)

    inp_seq = jax.random.randint(k1, (T, B), 0, V, dtype=jnp.int32)      # (T, B)
    rmn_hidden = jax.random.normal(k2, (n_layers, B, H), jnp.float32)
    cell = jax.random.normal(k3, (n_layers, B, H), jnp.float32)
    context = jax.random.normal(k4, (n_layers, B, H), jnp.float32)
    memory_tensor = jax.random.randint(k5, (M, B), 0, V, dtype=jnp.int32)

    # reference: T chained single-step module calls (driver feeds returned h, cell back)
    ref_outs, h_ref, c_ref = [], rmn_hidden, cell
    for t in range(T):
        o_t, h_ref, c_ref = reference_forward(params, inp_seq[t:t + 1], h_ref, c_ref,
                                              context, B, memory_tensor, M)
        ref_outs.append(o_t)
    ref_seq = jnp.stack(ref_outs)

    # ---- f32 weights: tight check (single-step API + fused T-step kernel) ----
    packed32 = pack_params(params, weights_dtype=jnp.float32)
    out0, h0_out, c0_out = recurrent_memory_forward(
        packed32, inp_seq[:1], rmn_hidden, cell, context, B, memory_tensor, M)
    jax.block_until_ready((out0, h0_out, c0_out))
    assert out0.shape == (B, V) and h0_out.shape == (n_layers, B, H)
    assert jnp.allclose(out0, ref_seq[0], atol=1e-4, rtol=1e-4), "single-step output mismatch"

    seq32, hT32, _ = recurrent_memory_forward_seq(
        packed32, inp_seq, rmn_hidden, cell, context, B, memory_tensor, M)
    jax.block_until_ready((seq32, hT32))
    assert jnp.allclose(seq32, ref_seq, atol=1e-4, rtol=1e-4), "fused-seq output mismatch (f32)"
    assert jnp.allclose(hT32, h_ref, atol=1e-4, rtol=1e-4), "fused-seq hidden mismatch (f32)"

    # ---- bf16 matmul weights (perf review #4): looser tolerance ----
    packed16 = pack_params(params, weights_dtype=jnp.bfloat16)
    seq16, hT16, _ = recurrent_memory_forward_seq(
        packed16, inp_seq, rmn_hidden, cell, context, B, memory_tensor, M)
    jax.block_until_ready((seq16, hT16))
    assert jnp.allclose(seq16, ref_seq, atol=5e-2, rtol=5e-2), "fused-seq output mismatch (bf16)"
    assert jnp.allclose(hT16, h_ref, atol=5e-2, rtol=5e-2), "fused-seq hidden mismatch (bf16)"

    print("KERNEL_OK")
</pallas_src>

<mosaic_0001>
module attributes {stable_mosaic.version = 11 : i64} {
  func.func @recurrent_memory_kernel(%arg0: i32, %arg1: memref<1x8x128xf32, #tpu.memory_space<vmem>>, %arg2: memref<8x16x256xf32, #tpu.memory_space<vmem>>, %arg3: memref<3x8x128xf32, #tpu.memory_space<vmem>>, %arg4: memref<640x512xf32, #tpu.memory_space<vmem>>, %arg5: memref<80x512xf32, #tpu.memory_space<vmem>>, %arg6: memref<256x128xf32, #tpu.memory_space<vmem>>, %arg7: memref<1x128xf32, #tpu.memory_space<vmem>>, %arg8: memref<1x8x128xf32, #tpu.memory_space<vmem>>, %arg9: memref<8x128xf32, #tpu.memory_space<vmem>>, %arg10: memref<8x128xf32, #tpu.memory_space<vmem>>, %arg11: memref<8x512xf32, #tpu.memory_space<vmem>>, %arg12: memref<8x128xf32, #tpu.memory_space<vmem>>) attributes {dimension_semantics = [#tpu.dimension_semantics<arbitrary>], iteration_bounds = array<i64: 1>, scalar_prefetch = 0 : i64, scratch_operands = 3 : i64, tpu.core_type = #tpu.core_type<tc>, window_params = [{transform_indices = @transform_0, window_bounds = array<i64: 1, 8, 128>}, {pipeline_mode = #tpu.pipeline_mode<synchronous>, transform_indices = @transform_1, window_bounds = array<i64: 8, 16, 256>}, {pipeline_mode = #tpu.pipeline_mode<synchronous>, transform_indices = @transform_2, window_bounds = array<i64: 3, 8, 128>}, {pipeline_mode = #tpu.pipeline_mode<synchronous>, transform_indices = @transform_3, window_bounds = array<i64: 640, 512>}, {pipeline_mode = #tpu.pipeline_mode<synchronous>, transform_indices = @transform_4, window_bounds = array<i64: 80, 512>}, {pipeline_mode = #tpu.pipeline_mode<synchronous>, transform_indices = @transform_5, window_bounds = array<i64: 256, 128>}, {pipeline_mode = #tpu.pipeline_mode<synchronous>, transform_indices = @transform_6, window_bounds = array<i64: 1, 128>}, {transform_indices = @transform_7, window_bounds = array<i64: 1, 8, 128>}, {pipeline_mode = #tpu.pipeline_mode<synchronous>, transform_indices = @transform_8, window_bounds = array<i64: 8, 128>}]} {
    %c0 = arith.constant 0 : index
    %c0_0 = arith.constant 0 : index
    %c0_1 = arith.constant 0 : index
    %0 = vector.load %arg3[%c0, %c0_0, %c0_1] : memref<3x8x128xf32, #tpu.memory_space<vmem>>, vector<1x8x128xf32>
    %1 = vector.shape_cast %0 : vector<1x8x128xf32> to vector<8x128xf32>
    %c2 = arith.constant 2 : index
    %c0_2 = arith.constant 0 : index
    %c0_3 = arith.constant 0 : index
    %2 = vector.load %arg3[%c2, %c0_2, %c0_3] : memref<3x8x128xf32, #tpu.memory_space<vmem>>, vector<1x8x128xf32>
    %3 = vector.shape_cast %2 : vector<1x8x128xf32> to vector<8x128xf32>
    %c0_i32 = arith.constant 0 : i32
    %4 = arith.cmpi eq, %arg0, %c0_i32 : i32
    %5 = arith.extui %4 : i1 to i32
    %c0_i32_4 = arith.constant 0 : i32
    %6 = arith.cmpi ne, %5, %c0_i32_4 : i32
    scf.if %6 {
      %c1 = arith.constant 1 : index
      %c0_55 = arith.constant 0 : index
      %c0_56 = arith.constant 0 : index
      %124 = vector.load %arg3[%c1, %c0_55, %c0_56] : memref<3x8x128xf32, #tpu.memory_space<vmem>>, vector<1x8x128xf32>
      %125 = vector.shape_cast %124 : vector<1x8x128xf32> to vector<8x128xf32>
      %c0_57 = arith.constant 0 : index
      %c0_58 = arith.constant 0 : index
      %126 = vector.load %arg10[%c0_57, %c0_58] : memref<8x128xf32, #tpu.memory_space<vmem>>, vector<8x128xf32>
      tpu.vector_store %arg10[%c0_57, %c0_58], %125 {strides = array<i32>} : memref<8x128xf32, #tpu.memory_space<vmem>>, vector<8x128xf32>,
      %c128_59 = arith.constant 128 : index
      %c0_60 = arith.constant 0 : index
      %127 = vector.load %arg4[%c128_59, %c0_60] : memref<640x512xf32, #tpu.memory_space<vmem>>, vector<128x512xf32>
      %cst_61 = arith.constant dense<0.000000e+00> : vector<8x512xf32>
      %128 = tpu.matmul %1, %127, %cst_61 {dimension_numbers = #tpu.dot_dimension_numbers<[1], [0], [0], [1], [0, 0, 1, 1], [], []>} : vector<8x128xf32>, vector<128x512xf32>, vector<8x512xf32> -> vector<8x512xf32>
      %c0_62 = arith.constant 0 : index
      %c0_63 = arith.constant 0 : index
      %129 = vector.load %arg5[%c0_62, %c0_63] : memref<80x512xf32, #tpu.memory_space<vmem>>, vector<1x512xf32>
      %130 = vector.broadcast %129 : vector<1x512xf32> to vector<8x512xf32>
      %131 = arith.addf %128, %130 : vector<8x512xf32>
      %c0_64 = arith.constant 0 : index
      %c0_65 = arith.constant 0 : index
      %132 = vector.load %arg11[%c0_64, %c0_65] : memref<8x512xf32, #tpu.memory_space<vmem>>, vector<8x512xf32>
      tpu.vector_store %arg11[%c0_64, %c0_65], %131 {strides = array<i32>} : memref<8x512xf32, #tpu.memory_space<vmem>>, vector<8x512xf32>,
      %c128_66 = arith.constant 128 : index
      %c0_67 = arith.constant 0 : index
      %133 = vector.load %arg6[%c128_66, %c0_67] : memref<256x128xf32, #tpu.memory_space<vmem>>, vector<128x128xf32>
      %cst_68 = arith.constant dense<0.000000e+00> : vector<8x128xf32>
      %134 = tpu.matmul %1, %133, %cst_68 {dimension_numbers = #tpu.dot_dimension_numbers<[1], [0], [0], [1], [0, 0, 1, 1], [], []>} : vector<8x128xf32>, vector<128x128xf32>, vector<8x128xf32> -> vector<8x128xf32>
      %c0_69 = arith.constant 0 : index
      %c0_70 = arith.constant 0 : index
      %135 = vector.load %arg7[%c0_69, %c0_70] : memref<1x128xf32, #tpu.memory_space<vmem>>, vector<1x128xf32>
      %136 = vector.broadcast %135 : vector<1x128xf32> to vector<8x128xf32>
      %137 = arith.addf %134, %136 : vector<8x128xf32>
      %c0_71 = arith.constant 0 : index
      %c0_72 = arith.constant 0 : index
      %138 = vector.load %arg12[%c0_71, %c0_72] : memref<8x128xf32, #tpu.memory_space<vmem>>, vector<8x128xf32>
      tpu.vector_store %arg12[%c0_71, %c0_72], %137 {strides = array<i32>} : memref<8x128xf32, #tpu.memory_space<vmem>>, vector<8x128xf32>,
    } else {
    }
    %c0_5 = arith.constant 0 : index
    %c0_6 = arith.constant 0 : index
    %c0_7 = arith.constant 0 : index
    %7 = vector.load %arg1[%c0_5, %c0_6, %c0_7] : memref<1x8x128xf32, #tpu.memory_space<vmem>>, vector<1x8x128xf32>
    %8 = vector.shape_cast %7 : vector<1x8x128xf32> to vector<8x128xf32>
    %cst = arith.constant 0.000000e+00 : f32
    %9 = vector.broadcast %cst : f32 to vector<8x128xf32>
    %10 = arith.maximumf %8, %9 : vector<8x128xf32>
    %c0_8 = arith.constant 0 : index
    %c0_9 = arith.constant 0 : index
    %11 = vector.load %arg10[%c0_8, %c0_9] : memref<8x128xf32, #tpu.memory_space<vmem>>, vector<8x128xf32>
    %c0_10 = arith.constant 0 : index
    %c0_11 = arith.constant 0 : index
    %12 = vector.load %arg4[%c0_10, %c0_11] : memref<640x512xf32, #tpu.memory_space<vmem>>, vector<128x512xf32>
    %cst_12 = arith.constant dense<0.000000e+00> : vector<8x512xf32>
    %13 = tpu.matmul %10, %12, %cst_12 {dimension_numbers = #tpu.dot_dimension_numbers<[1], [0], [0], [1], [0, 0, 1, 1], [], []>} : vector<8x128xf32>, vector<128x512xf32>, vector<8x512xf32> -> vector<8x512xf32>
    %c256 = arith.constant 256 : index
    %c0_13 = arith.constant 0 : index
    %14 = vector.load %arg4[%c256, %c0_13] : memref<640x512xf32, #tpu.memory_space<vmem>>, vector<128x512xf32>
    %cst_14 = arith.constant dense<0.000000e+00> : vector<8x512xf32>
    %15 = tpu.matmul %11, %14, %cst_14 {dimension_numbers = #tpu.dot_dimension_numbers<[1], [0], [0], [1], [0, 0, 1, 1], [], []>} : vector<8x128xf32>, vector<128x512xf32>, vector<8x512xf32> -> vector<8x512xf32>
    %16 = arith.addf %13, %15 : vector<8x512xf32>
    %c0_15 = arith.constant 0 : index
    %c0_16 = arith.constant 0 : index
    %17 = vector.load %arg11[%c0_15, %c0_16] : memref<8x512xf32, #tpu.memory_space<vmem>>, vector<8x512xf32>
    %18 = arith.addf %16, %17 : vector<8x512xf32>
    %19 = vector.extract_strided_slice %18 {offsets = [0, 0], sizes = [8, 128], strides = [1, 1]} : vector<8x512xf32> to vector<8x128xf32>
    %20 = arith.negf %19 : vector<8x128xf32>
    %21 = math.exp %20 : vector<8x128xf32>
    %cst_17 = arith.constant 1.000000e+00 : f32
    %22 = vector.broadcast %cst_17 : f32 to vector<8x128xf32>
    %23 = arith.addf %22, %21 : vector<8x128xf32>
    %24 = arith.divf %22, %23 : vector<8x128xf32>
    %25 = vector.extract_strided_slice %18 {offsets = [0, 128], sizes = [8, 128], strides = [1, 1]} : vector<8x512xf32> to vector<8x128xf32>
    %26 = arith.negf %25 : vector<8x128xf32>
    %27 = math.exp %26 : vector<8x128xf32>
    %cst_18 = arith.constant 1.000000e+00 : f32
    %28 = vector.broadcast %cst_18 : f32 to vector<8x128xf32>
    %29 = arith.addf %28, %27 : vector<8x128xf32>
    %30 = arith.divf %28, %29 : vector<8x128xf32>
    %31 = vector.extract_strided_slice %18 {offsets = [0, 256], sizes = [8, 128], strides = [1, 1]} : vector<8x512xf32> to vector<8x128xf32>
    %32 = math.tanh %31 : vector<8x128xf32>
    %33 = vector.extract_strided_slice %18 {offsets = [0, 384], sizes = [8, 128], strides = [1, 1]} : vector<8x512xf32> to vector<8x128xf32>
    %34 = arith.negf %33 : vector<8x128xf32>
    %35 = math.exp %34 : vector<8x128xf32>
    %cst_19 = arith.constant 1.000000e+00 : f32
    %36 = vector.broadcast %cst_19 : f32 to vector<8x128xf32>
    %37 = arith.addf %36, %35 : vector<8x128xf32>
    %38 = arith.divf %36, %37 : vector<8x128xf32>
    %39 = arith.mulf %30, %3 : vector<8x128xf32>
    %40 = arith.mulf %24, %32 : vector<8x128xf32>
    %41 = arith.addf %39, %40 : vector<8x128xf32>
    %42 = math.tanh %41 : vector<8x128xf32>
    %43 = arith.mulf %38, %42 : vector<8x128xf32>
    %c0_20 = arith.constant 0 : index
    %c0_21 = arith.constant 0 : index
    %c0_22 = arith.constant 0 : index
    %44 = vector.load %arg2[%c0_20, %c0_21, %c0_22] : memref<8x16x256xf32, #tpu.memory_space<vmem>>, vector<8x16x128xf32>
    %c0_23 = arith.constant 0 : index
    %c0_24 = arith.constant 0 : index
    %c128 = arith.constant 128 : index
    %45 = vector.load %arg2[%c0_23, %c0_24, %c128] : memref<8x16x256xf32, #tpu.memory_space<vmem>>, vector<8x16x128xf32>
    %46 = vector.shape_cast %43 : vector<8x128xf32> to vector<8x1x128xf32>
    %47 = vector.broadcast %46 : vector<8x1x128xf32> to vector<8x16x128xf32>
    %48 = arith.mulf %44, %47 : vector<8x16x128xf32>
    %cst_25 = arith.constant dense<0.000000e+00> : vector<8x16xf32>
    %49 = vector.multi_reduction <add>, %48, %cst_25 [2] : vector<8x16x128xf32> to vector<8x16xf32>
    %c48 = arith.constant 48 : index
    %c0_26 = arith.constant 0 : index
    %50 = vector.load %arg5[%c48, %c0_26] : memref<80x512xf32, #tpu.memory_space<vmem>>, vector<16x16xf32>
    %cst_27 = arith.constant dense<0.000000e+00> : vector<8x16xf32>
    %51 = tpu.matmul %49, %50, %cst_27 {dimension_numbers = #tpu.dot_dimension_numbers<[1], [0], [0], [1], [0, 0, 1, 1], [], []>} : vector<8x16xf32>, vector<16x16xf32>, vector<8x16xf32> -> vector<8x16xf32>
    %c64 = arith.constant 64 : index
    %c0_28 = arith.constant 0 : index
    %52 = vector.load %arg5[%c64, %c0_28] : memref<80x512xf32, #tpu.memory_space<vmem>>, vector<1x16xf32>
    %53 = vector.broadcast %52 : vector<1x16xf32> to vector<8x16xf32>
    %54 = arith.addf %51, %53 : vector<8x16xf32>
    %cst_29 = arith.constant dense<0xFF800000> : vector<8xf32>
    %55 = vector.multi_reduction <maximumf>, %54, %cst_29 [1] : vector<8x16xf32> to vector<8xf32>
    %56 = vector.shape_cast %55 : vector<8xf32> to vector<8x1xf32>
    %57 = vector.broadcast %56 : vector<8x1xf32> to vector<8x16xf32>
    %58 = arith.subf %54, %57 : vector<8x16xf32>
    %59 = math.exp %58 : vector<8x16xf32>
    %cst_30 = arith.constant dense<0.000000e+00> : vector<8xf32>
    %60 = vector.multi_reduction <add>, %59, %cst_30 [1] : vector<8x16xf32> to vector<8xf32>
    %61 = vector.shape_cast %60 : vector<8xf32> to vector<8x1xf32>
    %62 = math.log %61 : vector<8x1xf32>
    %63 = vector.broadcast %62 : vector<8x1xf32> to vector<8x16xf32>
    %64 = arith.subf %58, %63 : vector<8x16xf32>
    %65 = vector.shape_cast %64 : vector<8x16xf32> to vector<8x16x1xf32>
    %66 = vector.broadcast %65 : vector<8x16x1xf32> to vector<8x16x128xf32>
    %67 = arith.mulf %45, %66 : vector<8x16x128xf32>
    %cst_31 = arith.constant dense<0.000000e+00> : vector<8x128xf32>
    %68 = vector.multi_reduction <add>, %67, %cst_31 [1] : vector<8x16x128xf32> to vector<8x128xf32>
    %c384 = arith.constant 384 : index
    %c0_32 = arith.constant 0 : index
    %69 = vector.load %arg4[%c384, %c0_32] : memref<640x512xf32, #tpu.memory_space<vmem>>, vector<128x384xf32>
    %cst_33 = arith.constant dense<0.000000e+00> : vector<8x384xf32>
    %70 = tpu.matmul %68, %69, %cst_33 {dimension_numbers = #tpu.dot_dimension_numbers<[1], [0], [0], [1], [0, 0, 1, 1], [], []>} : vector<8x128xf32>, vector<128x384xf32>, vector<8x384xf32> -> vector<8x384xf32>
    %c16 = arith.constant 16 : index
    %c0_34 = arith.constant 0 : index
    %71 = vector.load %arg5[%c16, %c0_34] : memref<80x512xf32, #tpu.memory_space<vmem>>, vector<1x384xf32>
    %72 = vector.broadcast %71 : vector<1x384xf32> to vector<8x384xf32>
    %73 = arith.addf %70, %72 : vector<8x384xf32>
    %c512 = arith.constant 512 : index
    %c0_35 = arith.constant 0 : index
    %74 = vector.load %arg4[%c512, %c0_35] : memref<640x512xf32, #tpu.memory_space<vmem>>, vector<128x384xf32>
    %cst_36 = arith.constant dense<0.000000e+00> : vector<8x384xf32>
    %75 = tpu.matmul %43, %74, %cst_36 {dimension_numbers = #tpu.dot_dimension_numbers<[1], [0], [0], [1], [0, 0, 1, 1], [], []>} : vector<8x128xf32>, vector<128x384xf32>, vector<8x384xf32> -> vector<8x384xf32>
    %c32 = arith.constant 32 : index
    %c0_37 = arith.constant 0 : index
    %76 = vector.load %arg5[%c32, %c0_37] : memref<80x512xf32, #tpu.memory_space<vmem>>, vector<1x384xf32>
    %77 = vector.broadcast %76 : vector<1x384xf32> to vector<8x384xf32>
    %78 = arith.addf %75, %77 : vector<8x384xf32>
    %79 = vector.extract_strided_slice %73 {offsets = [0, 0], sizes = [8, 128], strides = [1, 1]} : vector<8x384xf32> to vector<8x128xf32>
    %80 = vector.extract_strided_slice %78 {offsets = [0, 0], sizes = [8, 128], strides = [1, 1]} : vector<8x384xf32> to vector<8x128xf32>
    %81 = arith.addf %79, %80 : vector<8x128xf32>
    %82 = arith.negf %81 : vector<8x128xf32>
    %83 = math.exp %82 : vector<8x128xf32>
    %cst_38 = arith.constant 1.000000e+00 : f32
    %84 = vector.broadcast %cst_38 : f32 to vector<8x128xf32>
    %85 = arith.addf %84, %83 : vector<8x128xf32>
    %86 = arith.divf %84, %85 : vector<8x128xf32>
    %87 = vector.extract_strided_slice %73 {offsets = [0, 128], sizes = [8, 128], strides = [1, 1]} : vector<8x384xf32> to vector<8x128xf32>
    %88 = vector.extract_strided_slice %78 {offsets = [0, 128], sizes = [8, 128], strides = [1, 1]} : vector<8x384xf32> to vector<8x128xf32>
    %89 = arith.addf %87, %88 : vector<8x128xf32>
    %90 = arith.negf %89 : vector<8x128xf32>
    %91 = math.exp %90 : vector<8x128xf32>
    %cst_39 = arith.constant 1.000000e+00 : f32
    %92 = vector.broadcast %cst_39 : f32 to vector<8x128xf32>
    %93 = arith.addf %92, %91 : vector<8x128xf32>
    %94 = arith.divf %92, %93 : vector<8x128xf32>
    %95 = vector.extract_strided_slice %73 {offsets = [0, 256], sizes = [8, 128], strides = [1, 1]} : vector<8x384xf32> to vector<8x128xf32>
    %96 = vector.extract_strided_slice %78 {offsets = [0, 256], sizes = [8, 128], strides = [1, 1]} : vector<8x384xf32> to vector<8x128xf32>
    %97 = arith.mulf %86, %96 : vector<8x128xf32>
    %98 = arith.addf %95, %97 : vector<8x128xf32>
    %99 = math.tanh %98 : vector<8x128xf32>
    %cst_40 = arith.constant 1.000000e+00 : f32
    %100 = vector.broadcast %cst_40 : f32 to vector<8x128xf32>
    %101 = arith.subf %100, %94 : vector<8x128xf32>
    %102 = arith.mulf %101, %99 : vector<8x128xf32>
    %103 = arith.mulf %94, %43 : vector<8x128xf32>
    %104 = arith.addf %102, %103 : vector<8x128xf32>
    %c0_41 = arith.constant 0 : index
    %c0_42 = arith.constant 0 : index
    %105 = vector.load %arg6[%c0_41, %c0_42] : memref<256x128xf32, #tpu.memory_space<vmem>>, vector<128x128xf32>
    %cst_43 = arith.constant dense<0.000000e+00> : vector<8x128xf32>
    %106 = tpu.matmul %104, %105, %cst_43 {dimension_numbers = #tpu.dot_dimension_numbers<[1], [0], [0], [1], [0, 0, 1, 1], [], []>} : vector<8x128xf32>, vector<128x128xf32>, vector<8x128xf32> -> vector<8x128xf32>
    %c0_44 = arith.constant 0 : index
    %c0_45 = arith.constant 0 : index
    %107 = vector.load %arg12[%c0_44, %c0_45] : memref<8x128xf32, #tpu.memory_space<vmem>>, vector<8x128xf32>
    %108 = arith.addf %106, %107 : vector<8x128xf32>
    %cst_46 = arith.constant dense<0xFF800000> : vector<8xf32>
    %109 = vector.multi_reduction <maximumf>, %108, %cst_46 [1] : vector<8x128xf32> to vector<8xf32>
    %110 = vector.shape_cast %109 : vector<8xf32> to vector<8x1xf32>
    %111 = vector.broadcast %110 : vector<8x1xf32> to vector<8x128xf32>
    %112 = arith.subf %108, %111 : vector<8x128xf32>
    %113 = math.exp %112 : vector<8x128xf32>
    %cst_47 = arith.constant dense<0.000000e+00> : vector<8xf32>
    %114 = vector.multi_reduction <add>, %113, %cst_47 [1] : vector<8x128xf32> to vector<8xf32>
    %115 = vector.shape_cast %114 : vector<8xf32> to vector<8x1xf32>
    %116 = math.log %115 : vector<8x1xf32>
    %117 = vector.broadcast %116 : vector<8x1xf32> to vector<8x128xf32>
    %118 = arith.subf %112, %117 : vector<8x128xf32>
    %c0_48 = arith.constant 0 : index
    %c0_49 = arith.constant 0 : index
    %c0_50 = arith.constant 0 : index
    %119 = vector.load %arg8[%c0_48, %c0_49, %c0_50] : memref<1x8x128xf32, #tpu.memory_space<vmem>>, vector<1x8x128xf32>
    %120 = vector.shape_cast %119 : vector<1x8x128xf32> to vector<8x128xf32>
    %121 = vector.shape_cast %118 : vector<8x128xf32> to vector<1x8x128xf32>
    tpu.vector_store %arg8[%c0_48, %c0_49, %c0_50], %121 {strides = array<i32>} : memref<1x8x128xf32, #tpu.memory_space<vmem>>, vector<1x8x128xf32>,
    %c0_51 = arith.constant 0 : index
    %c0_52 = arith.constant 0 : index
    %122 = vector.load %arg10[%c0_51, %c0_52] : memref<8x128xf32, #tpu.memory_space<vmem>>, vector<8x128xf32>
    tpu.vector_store %arg10[%c0_51, %c0_52], %43 {strides = array<i32>} : memref<8x128xf32, #tpu.memory_space<vmem>>, vector<8x128xf32>,
    %c0_53 = arith.constant 0 : index
    %c0_54 = arith.constant 0 : index
    %123 = vector.load %arg9[%c0_53, %c0_54] : memref<8x128xf32, #tpu.memory_space<vmem>>, vector<8x128xf32>
    tpu.vector_store %arg9[%c0_53, %c0_54], %43 {strides = array<i32>} : memref<8x128xf32, #tpu.memory_space<vmem>>, vector<8x128xf32>,
    return
  }
  func.func @transform_0(%arg0: i32) -> (i32, i32, i32) {
    %c0_i32 = arith.constant 0 : i32
    %c0_i32_0 = arith.constant 0 : i32
    %c0_i32_1 = arith.constant 0 : i32
    return %arg0, %c0_i32, %c0_i32_0 : i32, i32, i32
  }
  func.func @transform_1(%arg0: i32) -> (i32, i32, i32) {
    %c0_i32 = arith.constant 0 : i32
    %c0_i32_0 = arith.constant 0 : i32
    %c0_i32_1 = arith.constant 0 : i32
    %c0_i32_2 = arith.constant 0 : i32
    return %c0_i32, %c0_i32_0, %c0_i32_1 : i32, i32, i32
  }
  func.func @transform_2(%arg0: i32) -> (i32, i32, i32) {
    %c0_i32 = arith.constant 0 : i32
    %c0_i32_0 = arith.constant 0 : i32
    %c0_i32_1 = arith.constant 0 : i32
    %c0_i32_2 = arith.constant 0 : i32
    return %c0_i32, %c0_i32_0, %c0_i32_1 : i32, i32, i32
  }
  func.func @transform_3(%arg0: i32) -> (i32, i32) {
    %c0_i32 = arith.constant 0 : i32
    %c0_i32_0 = arith.constant 0 : i32
    %c0_i32_1 = arith.constant 0 : i32
    return %c0_i32, %c0_i32_0 : i32, i32
  }
  func.func @transform_4(%arg0: i32) -> (i32, i32) {
    %c0_i32 = arith.constant 0 : i32
    %c0_i32_0 = arith.constant 0 : i32
    %c0_i32_1 = arith.constant 0 : i32
    return %c0_i32, %c0_i32_0 : i32, i32
  }
  func.func @transform_5(%arg0: i32) -> (i32, i32) {
    %c0_i32 = arith.constant 0 : i32
    %c0_i32_0 = arith.constant 0 : i32
    %c0_i32_1 = arith.constant 0 : i32
    return %c0_i32, %c0_i32_0 : i32, i32
  }
  func.func @transform_6(%arg0: i32) -> (i32, i32) {
    %c0_i32 = arith.constant 0 : i32
    %c0_i32_0 = arith.constant 0 : i32
    %c0_i32_1 = arith.constant 0 : i32
    return %c0_i32, %c0_i32_0 : i32, i32
  }
  func.func @transform_7(%arg0: i32) -> (i32, i32, i32) {
    %c0_i32 = arith.constant 0 : i32
    %c0_i32_0 = arith.constant 0 : i32
    %c0_i32_1 = arith.constant 0 : i32
    return %arg0, %c0_i32, %c0_i32_0 : i32, i32, i32
  }
  func.func @transform_8(%arg0: i32) -> (i32, i32) {
    %c0_i32 = arith.constant 0 : i32
    %c0_i32_0 = arith.constant 0 : i32
    %c0_i32_1 = arith.constant 0 : i32
    return %c0_i32, %c0_i32_0 : i32, i32
  }
}

</mosaic_0001>

<bundles_post_ra>
// kernel: tpu_custom_call.1
= control target key start
LH: loop header
LB: loop body
LE: loop exit
PB: predicated region body
PF: predicated region fallthrough
CT: control target
= control target key end

     0   :  { %14 = vsyncpa [#allocation6], 0  ;;  %s3222_s0 = inlined_call_operand.hbm [shape: f32[1,8,128], index: 0, kind: input, shape index: {}]   ;;  %s3223_s1 = inlined_call_operand.hbm [shape: f32[8,16,256], index: 1, kind: input, shape index: {}]   ;;  %s3224_s2 = inlined_call_operand.hbm [shape: f32[3,8,128], index: 2, kind: input, shape index: {}]   ;;  %s3225_s3 = inlined_call_operand.hbm [shape: f32[640,512], index: 3, kind: input, shape index: {}]   ;;  %s3226_s4 = inlined_call_operand.hbm [shape: f32[80,512], index: 4, kind: input, shape index: {}]   ;;  %s3227_s5 = inlined_call_operand.hbm [shape: f32[256,128], index: 5, kind: input, shape index: {}]   ;;  %s3228_s6 = inlined_call_operand.hbm [shape: f32[1,128], index: 6, kind: input, shape index: {}]   ;;  %s3229_s7 = inlined_call_operand.hbm [shape: f32[1,8,128], index: 7, kind: output, shape index: {0}]   ;;  %s3230_s8 = inlined_call_operand.hbm [shape: f32[8,128], index: 8, kind: output, shape index: {1}]  }
   0x1   :  { %15 = vsyncpa [#allocation9], 0 }
   0x2   :  { %16 = vsyncpa [#allocation12], 0 }
   0x3   :  { %17 = vsyncpa [#allocation15], 0 }
   0x4   :  { %18 = vsyncpa [#allocation7], 0 }
   0x5   :  { %19 = vsyncpa [#allocation19], 0  ;;  %s2876_s27 = smov [#allocation8]   ;;  %s2666_s9 = scalar_lea.hbm %s3223_s1, 4096 }
   0x6   :  { %s35_s28 = sshll.u32 %s2876_s27, 4  ;;  %p2667_p0 = scmp.ne.s32.totalorder %s3223_s1, %s2666_s9  ;;  %s36_s28 = int_to_ptr.vmem [resolvable:$true] %s35_s28 }
   0x7   :  { %p2670_p1 = scmp.lt.u32.totalorder %s2666_s9, %s3223_s1 }
   0x9   :  { %p2672_p2 = pnand %p2670_p1, %p2667_p0 }
   0xb   :  { %2675 = shalt.err (!%p2672_p2)
}
   0xc   :  { %s2676_s14 = scalar_lea.vmem %s36_s28, 4096  ;;  %p2681_p4 = scmp.lt.s32.totalorder %s36_s28, %s36_s28 }
   0xd   :  { %p2677_p3 = scmp.ne.s32.totalorder %s36_s28, %s2676_s14  ;;  %p2682_p5 = scmp.lt.s32.totalorder %s2676_s14, %s2676_s14 }
   0xf   :  { %p2683_p6 = por %p2682_p5, %p2681_p4 }
  0x11   :  { %p2684_p7 = pnand %p2683_p6, %p2677_p3 }
  0x13   :  { %2687 = shalt.err (!%p2684_p7)
}
  0x14   :  { %s2877_s15 = smov 256   ;;  %s2878_s16 = smov 16  }
  0x15   :  { %41 = dma.hbm_to_vmem [thread:$0]  %s3223_s1, 4096, %s36_s28, [#allocation9], %s2877_s15, %s2877_s15, %s2878_s16  }
  0x16   :  { %s2879_s19 = smov [#allocation11]   ;;  %s2688_s23 = scalar_lea.hbm %s3225_s3, 40960 }
  0x17   :  { %s59_s20 = sshll.u32 %s2879_s19, 4  ;;  %p2689_p8 = scmp.ne.s32.totalorder %s3225_s3, %s2688_s23  ;;  %s60_s20 = int_to_ptr.vmem [resolvable:$true] %s59_s20 }
  0x18   :  { %p2692_p9 = scmp.lt.u32.totalorder %s2688_s23, %s3225_s3 }
  0x1a   :  { %p2694_p10 = pnand %p2692_p9, %p2689_p8 }
  0x1c   :  { %2697 = shalt.err (!%p2694_p10)
}
  0x1d   :  { %s2698_s29 = scalar_lea.vmem %s60_s20, 40960  ;;  %p2703_p12 = scmp.lt.s32.totalorder %s60_s20, %s60_s20 }
  0x1e   :  { %p2699_p11 = scmp.ne.s32.totalorder %s60_s20, %s2698_s29  ;;  %p2704_p13 = scmp.lt.s32.totalorder %s2698_s29, %s2698_s29 }
  0x20   :  { %p2705_p0 = por %p2704_p13, %p2703_p12 }
  0x22   :  { %p2706_p1 = pnand %p2705_p0, %p2699_p11 }
  0x24   :  { %2709 = shalt.err (!%p2706_p1)
}
  0x25   :  { %s2880_s1 = smov 512   ;;  %s2881_s28 = smov 32  }
  0x26   :  { %65 = dma.hbm_to_vmem [thread:$0]  %s3225_s3, 40960, %s60_s20, [#allocation12], %s2880_s1, %s2880_s1, %s2881_s28  }
  0x27   :  { %s2882_s10 = smov [#allocation14]   ;;  %s2883_s12 = smov [#allocation5]  }
  0x28   :  { %s83_s11 = sshll.u32 %s2882_s10, 4  ;;  %s26_s13 = sshll.u32 %s2883_s12, 4  ;;  %s84_s11 = int_to_ptr.vmem [resolvable:$true] %s83_s11  ;;  %s27_s13 = int_to_ptr.vmem [resolvable:$true] %s26_s13 }
  0x29   :  { %s2710_s16 = scalar_lea.hbm %s3227_s5, 4096 }
  0x2a   :  { %p2711_p2 = scmp.ne.s32.totalorder %s3227_s5, %s2710_s16  ;;  %p2714_p3 = scmp.lt.u32.totalorder %s2710_s16, %s3227_s5 }
  0x2c   :  { %p2716_p4 = pnand %p2714_p3, %p2711_p2 }
  0x2e   :  { %2719 = shalt.err (!%p2716_p4)
}
  0x2f   :  { %s2720_s3 = scalar_lea.vmem %s84_s11, 4096  ;;  %p2725_p6 = scmp.lt.s32.totalorder %s84_s11, %s84_s11 }
  0x30   :  { %p2721_p5 = scmp.ne.s32.totalorder %s84_s11, %s2720_s3  ;;  %p2726_p7 = scmp.lt.s32.totalorder %s2720_s3, %s2720_s3 }
  0x32   :  { %p2727_p8 = por %p2726_p7, %p2725_p6 }
  0x34   :  { %p2728_p9 = pnand %p2727_p8, %p2721_p5 }
  0x36   :  { %2731 = shalt.err (!%p2728_p9)
}
  0x37   :  { %s2884_s20 = smov 128   ;;  %s2885_s22 = smov 8  }
  0x38   :  { %89 = dma.hbm_to_vmem [thread:$0]  %s3227_s5, 4096, %s84_s11, [#allocation15], %s2884_s20, %s2884_s20, %s2885_s22  }
  0x39   :  { %s2732_s27 = scalar_lea.hbm %s3222_s0, 128 }
  0x3a   :  { %p2733_p10 = scmp.ne.s32.totalorder %s3222_s0, %s2732_s27  ;;  %p2736_p11 = scmp.lt.u32.totalorder %s2732_s27, %s3222_s0 }
  0x3c   :  { %p2738_p12 = pnand %p2736_p11, %p2733_p10 }
  0x3e   :  { %2741 = shalt.err (!%p2738_p12)
}
  0x3f   :  { %s2742_s12 = scalar_lea.vmem %s27_s13, 128  ;;  %p2747_p0 = scmp.lt.s32.totalorder %s27_s13, %s27_s13 }
  0x40   :  { %p2743_p13 = scmp.ne.s32.totalorder %s27_s13, %s2742_s12  ;;  %p2748_p1 = scmp.lt.s32.totalorder %s2742_s12, %s2742_s12 }
  0x42   :  { %p2749_p2 = por %p2748_p1, %p2747_p0 }
  0x44   :  { %p2750_p3 = pnand %p2749_p2, %p2743_p13 }
  0x46   :  { %2753 = shalt.err (!%p2750_p3)
}
  0x47   :  { %29 = dma.hbm_to_vmem [thread:$0]  %s3222_s0, 128, %s27_s13, [#allocation6]  }
  0x48   :  { %s2886_s14 = smov [#allocation10]   ;;  %s2887_s16 = smov [#allocation13]  }
  0x49   :  { %s47_s15 = sshll.u32 %s2886_s14, 4  ;;  %s71_s17 = sshll.u32 %s2887_s16, 4  ;;  %s48_s15 = int_to_ptr.vmem [resolvable:$true] %s47_s15  ;;  %s2994_s17 = int_to_ptr.vmem [resolvable:$true] %s71_s17 }
  0x4a   :  { %s2754_s21 = scalar_lea.hbm %s3224_s2, 384 }
  0x4b   :  { %p2755_p4 = scmp.ne.s32.totalorder %s3224_s2, %s2754_s21  ;;  %p2758_p5 = scmp.lt.u32.totalorder %s2754_s21, %s3224_s2 }
  0x4d   :  { %p2760_p6 = pnand %p2758_p5, %p2755_p4 }
  0x4f   :  { %2763 = shalt.err (!%p2760_p6)
}
  0x50   :  { %s2764_s0 = scalar_lea.vmem %s48_s15, 384  ;;  %p2769_p8 = scmp.lt.s32.totalorder %s48_s15, %s48_s15 }
  0x51   :  { %p2765_p7 = scmp.ne.s32.totalorder %s48_s15, %s2764_s0  ;;  %p2770_p9 = scmp.lt.s32.totalorder %s2764_s0, %s2764_s0 }
  0x53   :  { %p2771_p10 = por %p2770_p9, %p2769_p8 }
  0x55   :  { %p2772_p11 = pnand %p2771_p10, %p2765_p7 }
  0x57   :  { %2775 = shalt.err (!%p2772_p11)
}
  0x58   :  { %53 = dma.hbm_to_vmem [thread:$0]  %s3224_s2, 384, %s48_s15, [#allocation9], %s2884_s20, %s2884_s20, %s2885_s22  }
  0x59   :  { %s2776_s30 = scalar_lea.hbm %s3226_s4, 5120 }
  0x5a   :  { %p2777_p12 = scmp.ne.s32.totalorder %s3226_s4, %s2776_s30  ;;  %p2780_p13 = scmp.lt.u32.totalorder %s2776_s30, %s3226_s4 }
  0x5c   :  { %p2782_p0 = pnand %p2780_p13, %p2777_p12 }
  0x5e   :  { %2785 = shalt.err (!%p2782_p0)
}
  0x5f   :  { %s2786_s11 = scalar_lea.vmem %s2994_s17, 5120  ;;  %p2791_p2 = scmp.lt.s32.totalorder %s2994_s17, %s2994_s17 }
  0x60   :  { %p2787_p1 = scmp.ne.s32.totalorder %s2994_s17, %s2786_s11  ;;  %p2792_p3 = scmp.lt.s32.totalorder %s2786_s11, %s2786_s11 }
  0x62   :  { %p2793_p4 = por %p2792_p3, %p2791_p2 }
  0x64   :  { %p2794_p5 = pnand %p2793_p4, %p2787_p1 }
  0x66   :  { %2797 = shalt.err (!%p2794_p5)
}
  0x67   :  { %77 = dma.hbm_to_vmem [thread:$0]  %s3226_s4, 5120, %s2994_s17, [#allocation12], %s2880_s1, %s2880_s1, %s2881_s28  }
  0x68   :  { %s2888_s22 = smov [#allocation16]   ;;  %s2798_s18 = scalar_lea.hbm %s3228_s6, 16 }
  0x69   :  { %s96_s14 = sshll.u32 %s2888_s22, 4  ;;  %p2799_p6 = scmp.ne.s32.totalorder %s3228_s6, %s2798_s18  ;;  %s97_s14 = int_to_ptr.vmem [resolvable:$true] %s96_s14 }
  0x6a   :  { %p2802_p7 = scmp.lt.u32.totalorder %s2798_s18, %s3228_s6 }
  0x6c   :  { %p2804_p8 = pnand %p2802_p7, %p2799_p6 }
  0x6e   :  { %2807 = shalt.err (!%p2804_p8)
}
  0x6f   :  { %s2808_s24 = scalar_lea.vmem %s97_s14, 16  ;;  %s2812_s4 = scalar_lea.vmem %s97_s14, 32 }
  0x70   :  { %p2809_p9 = scmp.ne.s32.totalorder %s97_s14, %s2808_s24  ;;  %p2813_p10 = scmp.lt.s32.totalorder %s97_s14, %s97_s14 }
  0x71   :  { %p2814_p11 = scmp.lt.s32.totalorder %s2812_s4, %s2808_s24 }
  0x73   :  { %p2815_p12 = por %p2814_p11, %p2813_p10 }
  0x75   :  { %p2816_p13 = pnand %p2815_p12, %p2809_p9 }
  0x77   :  { %2819 = shalt.err (!%p2816_p13)
}
  0x78   :  { %99 = dma.hbm_to_vmem [thread:$0]  %s3228_s6, 16, %s97_s14, [#allocation15]  }
  0x79   :  { %2864 = dma.done.wait [#allocation6], 128  }
  0x7a   :  { %2865 = vsyncadd [#allocation6], 4294967168 }
  0x7b   :  { %2866 = dma.done.wait [#allocation9], 4480  }
  0x7c   :  { %2867 = vsyncadd [#allocation9], 4294962816 }
  0x7d   :  { %2868 = dma.done.wait [#allocation12], 46080  }
  0x7e   :  { %2869 = vsyncadd [#allocation12], 4294921216 }
  0x7f   :  { %2870 = dma.done.wait [#allocation15], 4112  }
  0x80   :  { %2871 = vsyncadd [#allocation15], 4294963184  ;;  %v2889_v0 = vmov 0.0|0.0   ;;  %v2890_v1 = vmov 0.0   ;;  %vm2891_vm0 = vmmov 0   ;;  %v132_v2 = vld [vmem:[#allocation11 + $0x208] sm:$0xff] }
  0x81   :  { %2300 = vmatprep.subr.bf16.mxu0 %v2889_v0  ;;  %281 = vmatprep.mubr.f32.mxu1 %v2890_v1  ;;  %v136_v3 = vld [vmem:[#allocation11 + $0x228] sm:$0xff]  ;;  %v363_v4 = vld [vmem:[#allocation14 + $0x80] sm:$0xff]  ;;  %v365_v13 = vld [vmem:[#allocation14 + $0x90] sm:$0xff]  ;;  %vm1104_vm1 = vcmask 130112   ;;  %vm1169_vm2 = vcmask 1041409   ;;  %vm1171_vm3 = vcmask 1042434  }
  0x82   :  { %2121 = vmatprep.mubr.msk.f32.mxu0 %vm2891_vm0, %v2890_v1  ;;  %v2236_v5 = vpack.c.bf16 %v136_v3, %v132_v2  ;;  %v364_v6 = vld [vmem:[#allocation14 + $0x88] sm:$0xff]  ;;  %v131_v7 = vld [vmem:[#allocation11 + $0x200] sm:$0xff]  ;;  %v366_v15 = vld [vmem:[#allocation14 + $0x98] sm:$0xff]  ;;  %vm1173_vm4 = vcmask 1043459   ;;  %vm1175_vm5 = vcmask 1044484   ;;  %vm1177_vm6 = vcmask 1045509  }
  0x83   :  { %v135_v8 = vld [vmem:[#allocation11 + $0x220] sm:$0xff]  ;;  %v2301_v9 = vpack.c.bf16 %v364_v6, %v363_v4  ;;  %v140_v11 = vld [vmem:[#allocation11 + $0x248] sm:$0xff]  ;;  %v2304_v18 = vpack.c.bf16 %v366_v15, %v365_v13  ;;  %v369_v31 = vld [vmem:[#allocation14 + $0xb0] sm:$0xff]  ;;  %vm1179_vm7 = vcmask 1046534   ;;  %vm1181_vm8 = vcmask 1047559   ;;  %s2893_s6 = smov [#allocation18]  }
  0x84   :  { %v2238_v10 = vpack.c.bf16 %v135_v8, %v131_v7  ;;  %v144_v12 = vld [vmem:[#allocation11 + $0x268] sm:$0xff]  ;;  %2237 = vmatprep.subr.bf16.mxu1 %v2236_v5  ;;  %v139_v16 = vld [vmem:[#allocation11 + $0x240] sm:$0xff]  ;;  %v370_v33 = vld [vmem:[#allocation14 + $0xb8] sm:$0xff]  ;;  %vm1183_vm9 = vcmask 130048   ;;  %s1995_s17 = sshll.u32 %s2893_s6, 4  ;;  %s1996_s17 = int_to_ptr.vmem [resolvable:$true] %s1995_s17 }
  0x85   :  { %v2240_v14 = vpack.c.bf16 %v144_v12, %v140_v11  ;;  %v143_v17 = vld [vmem:[#allocation11 + $0x260] sm:$0xff]  ;;  %2302 = vmatpush3.bf16.msra.mxu0 %v2301_v9  ;;  %v148_v20 = vld [vmem:[#allocation11 + $0x288] sm:$0xff]  ;;  %v2310_v38 = vpack.c.bf16 %v370_v33, %v369_v31  ;;  %v373_v49 = vld [vmem:[#allocation14 + $0xd0] sm:$0xff]  ;;  %s2820_s25 = scalar_lea.vmem %s1996_s17, 128  ;;  %p2825_p1 = scmp.lt.s32.totalorder %s1996_s17, %s1996_s17 }
  0x86   :  { %2239 = vmatpush1.bf16.msra.mxu1 %v2238_v10  ;;  %v2242_v19 = vpack.c.bf16 %v143_v17, %v139_v16  ;;  %v152_v21 = vld [vmem:[#allocation11 + $0x2a8] sm:$0xff]  ;;  %v367_v22 = vld [vmem:[#allocation14 + $0xa0] sm:$0xff]  ;;  %2303 = vmatprep.subr.bf16.mxu0 %v2889_v0  ;;  %v374_v51 = vld [vmem:[#allocation14 + $0xd8] sm:$0xff]  ;;  %p2821_p0 = scmp.ne.s32.totalorder %s1996_s17, %s2820_s25  ;;  %p2826_p2 = scmp.lt.s32.totalorder %s2820_s25, %s2820_s25 }
  0x87   :  { %2241 = vmatprep.subr.bf16.mxu1 %v2240_v14  ;;  %v2244_v23 = vpack.c.bf16 %v152_v21, %v148_v20  ;;  %v368_v24 = vld [vmem:[#allocation14 + $0xa8] sm:$0xff]  ;;  %v147_v25 = vld [vmem:[#allocation11 + $0x280] sm:$0xff]  ;;  %v2316_v56 = vpack.c.bf16 %v374_v51, %v373_v49  ;;  %v377_v5 = vld [vmem:[#allocation14 + $0xf0] sm:$0xff] }
  0x88   :  { %v151_v26 = vld [vmem:[#allocation11 + $0x2a0] sm:$0xff]  ;;  %v156_v27 = vld [vmem:[#allocation11 + $0x2c8] sm:$0xff]  ;;  %v2307_v29 = vpack.c.bf16 %v368_v24, %v367_v22  ;;  %v378_v6 = vld [vmem:[#allocation14 + $0xf8] sm:$0xff]  ;;  %p2827_p3 = por %p2826_p2, %p2825_p1 }
  0x89   :  { %v160_v28 = vld [vmem:[#allocation11 + $0x2e8] sm:$0xff]  ;;  %2305 = vmatpush3.bf16.msra.mxu0 %v2304_v18  ;;  %v2246_v30 = vpack.c.bf16 %v151_v26, %v147_v25  ;;  %v155_v34 = vld [vmem:[#allocation11 + $0x2c0] sm:$0xff]  ;;  %v134_v12 = vld [vmem:[#allocation11 + $0x218] sm:$0xff]  ;;  %v2322_v14 = vpack.c.bf16 %v378_v6, %v377_v5 }
  0x8a   :  { %2243 = vmatpush1.bf16.msra.mxu1 %v2242_v19  ;;  %2306 = vmatprep.subr.bf16.mxu0 %v2889_v0  ;;  %v2248_v32 = vpack.c.bf16 %v160_v28, %v156_v27  ;;  %v159_v35 = vld [vmem:[#allocation11 + $0x2e0] sm:$0xff]  ;;  %v164_v36 = vld [vmem:[#allocation11 + $0x308] sm:$0xff]  ;;  %v138_v13 = vld [vmem:[#allocation11 + $0x238] sm:$0xff]  ;;  %p2828_p4 = pnand %p2827_p3, %p2821_p0 }
  0x8b   :  { %2245 = vmatprep.subr.bf16.mxu1 %v2244_v23  ;;  %v168_v37 = vld [vmem:[#allocation11 + $0x328] sm:$0xff]  ;;  %v2250_v39 = vpack.c.bf16 %v159_v35, %v155_v34  ;;  %v371_v40 = vld [vmem:[#allocation14 + $0xc0] sm:$0xff]  ;;  %v2268_v19 = vpack.c.bf16 %v138_v13, %v134_v12  ;;  %v133_v20 = vld [vmem:[#allocation11 + $0x210] sm:$0xff] }
  0x8c   :  { %v2252_v41 = vpack.c.bf16 %v168_v37, %v164_v36  ;;  %v372_v42 = vld [vmem:[#allocation14 + $0xc8] sm:$0xff]  ;;  %v163_v43 = vld [vmem:[#allocation11 + $0x300] sm:$0xff]  ;;  %v137_v21 = vld [vmem:[#allocation11 + $0x230] sm:$0xff] }
  0x8d   :  { %2308 = vmatpush3.bf16.msra.mxu0 %v2307_v29  ;;  %v167_v44 = vld [vmem:[#allocation11 + $0x320] sm:$0xff]  ;;  %v172_v45 = vld [vmem:[#allocation11 + $0x348] sm:$0xff]  ;;  %v2313_v47 = vpack.c.bf16 %v372_v42, %v371_v40  ;;  %v142_v24 = vld [vmem:[#allocation11 + $0x258] sm:$0xff]  ;;  %v2270_v28 = vpack.c.bf16 %v137_v21, %v133_v20 }
  0x8e   :  { %2247 = vmatpush1.bf16.msra.mxu1 %v2246_v30  ;;  %2309 = vmatprep.subr.bf16.mxu0 %v2889_v0  ;;  %v176_v46 = vld [vmem:[#allocation11 + $0x368] sm:$0xff]  ;;  %v2254_v48 = vpack.c.bf16 %v167_v44, %v163_v43  ;;  %v171_v52 = vld [vmem:[#allocation11 + $0x340] sm:$0xff]  ;;  %v146_v25 = vld [vmem:[#allocation11 + $0x278] sm:$0xff] }
  0x8f   :  { %2249 = vmatprep.subr.bf16.mxu1 %v2248_v32  ;;  %v2256_v50 = vpack.c.bf16 %v176_v46, %v172_v45  ;;  %v175_v53 = vld [vmem:[#allocation11 + $0x360] sm:$0xff]  ;;  %v180_v54 = vld [vmem:[#allocation11 + $0x388] sm:$0xff]  ;;  %v2272_v32 = vpack.c.bf16 %v146_v25, %v142_v24  ;;  %v141_v33 = vld [vmem:[#allocation11 + $0x250] sm:$0xff] }
  0x90   :  { %v184_v55 = vld [vmem:[#allocation11 + $0x3a8] sm:$0xff]  ;;  %v2258_v57 = vpack.c.bf16 %v175_v53, %v171_v52  ;;  %v375_v58 = vld [vmem:[#allocation14 + $0xe0] sm:$0xff]  ;;  %v145_v34 = vld [vmem:[#allocation11 + $0x270] sm:$0xff] }
  0x91   :  { %2311 = vmatpush3.bf16.msra.mxu0 %v2310_v38  ;;  %v2260_v59 = vpack.c.bf16 %v184_v55, %v180_v54  ;;  %v376_v60 = vld [vmem:[#allocation14 + $0xe8] sm:$0xff]  ;;  %v179_v61 = vld [vmem:[#allocation11 + $0x380] sm:$0xff]  ;;  %v150_v37 = vld [vmem:[#allocation11 + $0x298] sm:$0xff]  ;;  %v2274_v40 = vpack.c.bf16 %v145_v34, %v141_v33 }
  0x92   :  { %2251 = vmatpush1.bf16.msra.mxu1 %v2250_v39  ;;  %2312 = vmatprep.subr.bf16.mxu0 %v2889_v0  ;;  %v183_v62 = vld [vmem:[#allocation11 + $0x3a0] sm:$0xff]  ;;  %v188_v63 = vld [vmem:[#allocation11 + $0x3c8] sm:$0xff]  ;;  %v2319_v3 = vpack.c.bf16 %v376_v60, %v375_v58  ;;  %v154_v38 = vld [vmem:[#allocation11 + $0x2b8] sm:$0xff] }
  0x93   :  { %2253 = vmatprep.subr.bf16.mxu1 %v2252_v41  ;;  %v192_v2 = vld [vmem:[#allocation11 + $0x3e8] sm:$0xff]  ;;  %v2262_v4 = vpack.c.bf16 %v183_v62, %v179_v61  ;;  %v187_v8 = vld [vmem:[#allocation11 + $0x3c0] sm:$0xff]  ;;  %v2276_v44 = vpack.c.bf16 %v154_v38, %v150_v37  ;;  %v149_v45 = vld [vmem:[#allocation11 + $0x290] sm:$0xff] }
  0x94   :  { %v2264_v7 = vpack.c.bf16 %v192_v2, %v188_v63  ;;  %v191_v9 = vld [vmem:[#allocation11 + $0x3e0] sm:$0xff]  ;;  %v525_v10 = vld [vmem:[#allocation11 + $0x408] sm:$0xff]  ;;  %v153_v46 = vld [vmem:[#allocation11 + $0x2b0] sm:$0xff] }
  0x95   :  { %2314 = vmatpush3.bf16.msra.mxu0 %v2313_v47  ;;  %v529_v11 = vld [vmem:[#allocation11 + $0x428] sm:$0xff]  ;;  %v2266_v15 = vpack.c.bf16 %v191_v9, %v187_v8  ;;  %v524_v16 = vld [vmem:[#allocation11 + $0x400] sm:$0xff]  ;;  %v158_v49 = vld [vmem:[#allocation11 + $0x2d8] sm:$0xff]  ;;  %v2278_v52 = vpack.c.bf16 %v153_v46, %v149_v45 }
  0x96   :  { %2255 = vmatpush1.bf16.msra.mxu1 %v2254_v48  ;;  %2315 = vmatprep.subr.bf16.mxu0 %v2889_v0  ;;  %v528_v17 = vld [vmem:[#allocation11 + $0x420] sm:$0xff]  ;;  %v2324_v18 = vpack.c.bf16 %v529_v11, %v525_v10  ;;  %v533_v22 = vld [vmem:[#allocation11 + $0x448] sm:$0xff]  ;;  %v161_v58 = vld [vmem:[#allocation11 + $0x2f0] sm:$0xff] }
  0x97   :  { %2257 = vmatprep.subr.bf16.mxu1 %v2256_v50  ;;  %v537_v23 = vld [vmem:[#allocation11 + $0x468] sm:$0xff]  ;;  %v2326_v27 = vpack.c.bf16 %v528_v17, %v524_v16  ;;  %v532_v29 = vld [vmem:[#allocation11 + $0x440] sm:$0xff]  ;;  %v162_v50 = vld [vmem:[#allocation11 + $0x2f8] sm:$0xff] }
  0x98   :  { %v3054_v26 = vld [vmem:[#allocation10] sm:$0xff]  ;;  %v536_v30 = vld [vmem:[#allocation11 + $0x460] sm:$0xff]  ;;  %v2328_v31 = vpack.c.bf16 %v537_v23, %v533_v22  ;;  %v166_v61 = vld [vmem:[#allocation11 + $0x318] sm:$0xff] }
  0x99   :  { %2317 = vmatpush3.bf16.msra.mxu0 %v2316_v56  ;;  %v541_v35 = vld [vmem:[#allocation11 + $0x488] sm:$0xff]  ;;  %v2330_v39 = vpack.c.bf16 %v536_v30, %v532_v29  ;;  %v540_v41 = vld [vmem:[#allocation11 + $0x480] sm:$0xff]  ;;  %v2280_v56 = vpack.c.bf16 %v162_v50, %v158_v49  ;;  %v170_v62 = vld [vmem:[#allocation11 + $0x338] sm:$0xff] }
  0x9a   :  { %2259 = vmatpush1.bf16.msra.mxu1 %v2258_v57  ;;  %2318 = vmatprep.subr.bf16.mxu0 %v2889_v0  ;;  %v545_v36 = vld [vmem:[#allocation11 + $0x4a8] sm:$0xff]  ;;  %v544_v42 = vld [vmem:[#allocation11 + $0x4a0] sm:$0xff]  ;;  %v157_v57 = vld [vmem:[#allocation11 + $0x2d0] sm:$0xff]  ;;  %v2284_v6 = vpack.c.bf16 %v170_v62, %v166_v61 }
  0x9b   :  { %2261 = vmatprep.subr.bf16.mxu1 %v2260_v59  ;;  %v2332_v43 = vpack.c.bf16 %v545_v36, %v541_v35  ;;  %v549_v47 = vld [vmem:[#allocation11 + $0x4c8] sm:$0xff]  ;;  %v2334_v51 = vpack.c.bf16 %v544_v42, %v540_v41  ;;  %v548_v53 = vld [vmem:[#allocation11 + $0x4c0] sm:$0xff]  ;;  %v2282_v2 = vpack.c.bf16 %v161_v58, %v157_v57  ;;  %v169_v8 = vld [vmem:[#allocation11 + $0x330] sm:$0xff] }
  0x9c   :  { %v553_v48 = vld [vmem:[#allocation11 + $0x4e8] sm:$0xff]  ;;  %v552_v54 = vld [vmem:[#allocation11 + $0x4e0] sm:$0xff]  ;;  %v174_v11 = vld [vmem:[#allocation11 + $0x358] sm:$0xff] }
  0x9d   :  { %2320 = vmatpush3.bf16.msra.mxu0 %v2319_v3  ;;  %v2336_v55 = vpack.c.bf16 %v553_v48, %v549_v47  ;;  %v557_v59 = vld [vmem:[#allocation11 + $0x508] sm:$0xff]  ;;  %v2338_v63 = vpack.c.bf16 %v552_v54, %v548_v53  ;;  %v556_v3 = vld [vmem:[#allocation11 + $0x500] sm:$0xff]  ;;  %v178_v12 = vld [vmem:[#allocation11 + $0x378] sm:$0xff] }
  0x9e   :  { %2263 = vmatpush1.bf16.msra.mxu1 %v2262_v4  ;;  %2321 = vmatprep.subr.bf16.mxu0 %v2889_v0  ;;  %v561_v60 = vld [vmem:[#allocation11 + $0x528] sm:$0xff]  ;;  %v560_v4 = vld [vmem:[#allocation11 + $0x520] sm:$0xff]  ;;  %v177_v20 = vld [vmem:[#allocation11 + $0x370] sm:$0xff] }
  0x9f   :  { %2265 = vmatprep.subr.bf16.mxu1 %v2264_v7  ;;  %v2340_v5 = vpack.c.bf16 %v561_v60, %v557_v59  ;;  %v165_v7 = vld [vmem:[#allocation11 + $0x310] sm:$0xff]  ;;  %v565_v9 = vld [vmem:[#allocation11 + $0x548] sm:$0xff]  ;;  %v2342_v13 = vpack.c.bf16 %v560_v4, %v556_v3  ;;  %v568_v16 = vld [vmem:[#allocation11 + $0x560] sm:$0xff] }
  0xa0   :  { %v569_v10 = vld [vmem:[#allocation11 + $0x568] sm:$0xff]  ;;  %v182_v23 = vld [vmem:[#allocation11 + $0x398] sm:$0xff]  ;;  %v576_v29 = vld [vmem:[#allocation11 + $0x5a0] sm:$0xff] }
  0xa1   :  { %2323 = vmatpush3.bf16.msra.mxu0 %v2322_v14  ;;  %v2286_v14 = vpack.c.bf16 %v169_v8, %v165_v7  ;;  %v2344_v17 = vpack.c.bf16 %v569_v10, %v565_v9  ;;  %v573_v21 = vld [vmem:[#allocation11 + $0x588] sm:$0xff]  ;;  %v186_v24 = vld [vmem:[#allocation11 + $0x3b8] sm:$0xff]  ;;  %v185_v33 = vld [vmem:[#allocation11 + $0x3b0] sm:$0xff] }
  0xa2   :  { %2267 = vmatpush1.bf16.msra.mxu1 %v2266_v15  ;;  %2325 = vmatprep.subr.bf16.mxu0 %v2324_v18  ;;  %v564_v15 = vld [vmem:[#allocation11 + $0x540] sm:$0xff]  ;;  %v2288_v18 = vpack.c.bf16 %v178_v12, %v174_v11  ;;  %v577_v22 = vld [vmem:[#allocation11 + $0x5a8] sm:$0xff]  ;;  %v190_v36 = vld [vmem:[#allocation11 + $0x3d8] sm:$0xff] }
  0xa3   :  { %2269 = vmatprep.subr.bf16.mxu1 %v2268_v19  ;;  %v173_v19 = vld [vmem:[#allocation11 + $0x350] sm:$0xff]  ;;  %v2346_v25 = vpack.c.bf16 %v568_v16, %v564_v15  ;;  %v2348_v30 = vpack.c.bf16 %v577_v22, %v573_v21  ;;  %v581_v34 = vld [vmem:[#allocation11 + $0x5c8] sm:$0xff]  ;;  %v194_v37 = vld [vmem:[#allocation11 + $0x3f8] sm:$0xff] }
  0xa4   :  { %2122 = vmatmul.mubr.f32.vlgmr.msra.gmra.mrb[0].mxu0 %v3054_v26  ;;  %v585_v35 = vld [vmem:[#allocation11 + $0x5e8] sm:$0xff]  ;;  %v584_v41 = vld [vmem:[#allocation11 + $0x5e0] sm:$0xff]  ;;  %v193_v45 = vld [vmem:[#allocation11 + $0x3f0] sm:$0xff] }
  0xa5   :  { %282 = vmatmul.mubr.f32.vlgmr.msra.gmra.mrb[0].mxu1 %v3054_v26  ;;  %2327 = vmatpush1.bf16.msra.mxu0 %v2326_v27  ;;  %v2290_v27 = vpack.c.bf16 %v177_v20, %v173_v19  ;;  %v2352_v42 = vpack.c.bf16 %v585_v35, %v581_v34  ;;  %v461_v46 = vld [vmem:[#allocation11 + $0x8] sm:$0xff]  ;;  %v527_v48 = vld [vmem:[#allocation11 + $0x418] sm:$0xff]  ;;  %v464_v53 = vld [vmem:[#allocation11 + $0x20] sm:$0xff] }
  0xa6   :  { %2271 = vmatpush1.bf16.msra.mxu1 %v2270_v28  ;;  %2329 = vmatprep.subr.bf16.mxu0 %v2328_v31  ;;  %v572_v28 = vld [vmem:[#allocation11 + $0x580] sm:$0xff]  ;;  %v2292_v31 = vpack.c.bf16 %v186_v24, %v182_v23  ;;  %v465_v47 = vld [vmem:[#allocation11 + $0x28] sm:$0xff]  ;;  %v531_v49 = vld [vmem:[#allocation11 + $0x438] sm:$0xff] }
  0xa7   :  { %2273 = vmatprep.subr.bf16.mxu1 %v2272_v32  ;;  %652 = vmatprep.mubr.f32.mxu0 %v2890_v1  ;;  %v181_v32 = vld [vmem:[#allocation11 + $0x390] sm:$0xff]  ;;  %v2350_v38 = vpack.c.bf16 %v576_v29, %v572_v28  ;;  %v2388_v54 = vpack.c.bf16 %v465_v47, %v461_v46  ;;  %v469_v58 = vld [vmem:[#allocation11 + $0x48] sm:$0xff]  ;;  %v535_v60 = vld [vmem:[#allocation11 + $0x458] sm:$0xff] }
  0xa8   :  { %352 = vmatprep.mubr.f32.mxu1 %v2890_v1  ;;  %v530_v57 = vld [vmem:[#allocation11 + $0x430] sm:$0xff]  ;;  %v473_v59 = vld [vmem:[#allocation11 + $0x68] sm:$0xff]  ;;  %v539_v61 = vld [vmem:[#allocation11 + $0x478] sm:$0xff] }
  0xa9   :  { %2331 = vmatpush1.bf16.msra.mxu0 %v2330_v39  ;;  %v2294_v39 = vpack.c.bf16 %v185_v33, %v181_v32  ;;  %v3060_v62 = vld [vmem:[#allocation10 + $0x8] sm:$0xff]  ;;  %v468_v3 = vld [vmem:[#allocation11 + $0x40] sm:$0xff]  ;;  %v477_v9 = vld [vmem:[#allocation11 + $0x88] sm:$0xff] }
  0xaa   :  { %2275 = vmatpush1.bf16.msra.mxu1 %v2274_v40  ;;  %2333 = vmatprep.subr.bf16.mxu0 %v2332_v43  ;;  %v580_v40 = vld [vmem:[#allocation11 + $0x5c0] sm:$0xff]  ;;  %v2296_v43 = vpack.c.bf16 %v194_v37, %v190_v36  ;;  %v534_v7 = vld [vmem:[#allocation11 + $0x450] sm:$0xff]  ;;  %v481_v10 = vld [vmem:[#allocation11 + $0xa8] sm:$0xff] }
  0xab   :  { %2277 = vmatprep.subr.bf16.mxu1 %v2276_v44  ;;  %v189_v44 = vld [vmem:[#allocation11 + $0x3d0] sm:$0xff]  ;;  %v2354_v50 = vpack.c.bf16 %v584_v41, %v580_v40  ;;  %v472_v4 = vld [vmem:[#allocation11 + $0x60] sm:$0xff]  ;;  %v543_v11 = vld [vmem:[#allocation11 + $0x498] sm:$0xff] }
  0xac   :  { %v538_v8 = vld [vmem:[#allocation11 + $0x470] sm:$0xff]  ;;  %v547_v12 = vld [vmem:[#allocation11 + $0x4b8] sm:$0xff]  ;;  %v476_v15 = vld [vmem:[#allocation11 + $0x80] sm:$0xff] }
  0xad   :  { %2335 = vmatpush1.bf16.msra.mxu0 %v2334_v51  ;;  %v2298_v51 = vpack.c.bf16 %v193_v45, %v189_v44  ;;  %v480_v16 = vld [vmem:[#allocation11 + $0xa0] sm:$0xff]  ;;  %v542_v19 = vld [vmem:[#allocation11 + $0x490] sm:$0xff]  ;;  %v485_v21 = vld [vmem:[#allocation11 + $0xc8] sm:$0xff] }
  0xae   :  { %2279 = vmatpush1.bf16.msra.mxu1 %v2278_v52  ;;  %2337 = vmatprep.subr.bf16.mxu0 %v2336_v55  ;;  %v460_v52 = vld [vmem:[#allocation11] sm:$0xff]  ;;  %v2356_v55 = vpack.c.bf16 %v531_v49, %v527_v48  ;;  %v546_v20 = vld [vmem:[#allocation11 + $0x4b0] sm:$0xff]  ;;  %v489_v22 = vld [vmem:[#allocation11 + $0xe8] sm:$0xff] }
  0xaf   :  { %2281 = vmatprep.subr.bf16.mxu1 %v2280_v56  ;;  %v526_v56 = vld [vmem:[#allocation11 + $0x410] sm:$0xff]  ;;  %v551_v23 = vld [vmem:[#allocation11 + $0x4d8] sm:$0xff]  ;;  %v488_v28 = vld [vmem:[#allocation11 + $0xe0] sm:$0xff]  ;;  %v2400_v29 = vpack.c.bf16 %v489_v22, %v485_v21 }
  0xb0   :  { %v555_v24 = vld [vmem:[#allocation11 + $0x4f8] sm:$0xff]  ;;  %v554_v32 = vld [vmem:[#allocation11 + $0x4f0] sm:$0xff]  ;;  %v493_v33 = vld [vmem:[#allocation11 + $0x108] sm:$0xff] }
  0xb1   :  { %2339 = vmatpush1.bf16.msra.mxu0 %v2338_v63  ;;  %v2390_v63 = vpack.c.bf16 %v464_v53, %v460_v52  ;;  %v497_v34 = vld [vmem:[#allocation11 + $0x128] sm:$0xff]  ;;  %v559_v35 = vld [vmem:[#allocation11 + $0x518] sm:$0xff]  ;;  %v496_v40 = vld [vmem:[#allocation11 + $0x120] sm:$0xff] }
  0xb2   :  { %2283 = vmatpush1.bf16.msra.mxu1 %v2282_v2  ;;  %2341 = vmatprep.subr.bf16.mxu0 %v2340_v5  ;;  %v2358_v2 = vpack.c.bf16 %v530_v57, %v526_v56  ;;  %v2392_v5 = vpack.c.bf16 %v473_v59, %v469_v58  ;;  %v563_v36 = vld [vmem:[#allocation11 + $0x538] sm:$0xff]  ;;  %v2404_v41 = vpack.c.bf16 %v497_v34, %v493_v33  ;;  %v562_v44 = vld [vmem:[#allocation11 + $0x530] sm:$0xff]  ;;  %v501_v45 = vld [vmem:[#allocation11 + $0x148] sm:$0xff] }
  0xb3   :  { %2285 = vmatprep.subr.bf16.mxu1 %v2284_v6  ;;  %v2360_v6 = vpack.c.bf16 %v539_v61, %v535_v60  ;;  %v505_v46 = vld [vmem:[#allocation11 + $0x168] sm:$0xff]  ;;  %v567_v47 = vld [vmem:[#allocation11 + $0x558] sm:$0xff]  ;;  %v504_v52 = vld [vmem:[#allocation11 + $0x160] sm:$0xff] }
  0xb4   :  { %v571_v48 = vld [vmem:[#allocation11 + $0x578] sm:$0xff]  ;;  %v2408_v53 = vpack.c.bf16 %v505_v46, %v501_v45  ;;  %v570_v56 = vld [vmem:[#allocation11 + $0x570] sm:$0xff]  ;;  %v509_v57 = vld [vmem:[#allocation11 + $0x188] sm:$0xff] }
  0xb5   :  { %2343 = vmatpush1.bf16.msra.mxu0 %v2342_v13  ;;  %v2394_v13 = vpack.c.bf16 %v472_v4, %v468_v3  ;;  %v513_v58 = vld [vmem:[#allocation11 + $0x1a8] sm:$0xff]  ;;  %v575_v59 = vld [vmem:[#allocation11 + $0x598] sm:$0xff]  ;;  %v512_v3 = vld [vmem:[#allocation11 + $0x1a0] sm:$0xff] }
  0xb6   :  { %2287 = vmatpush1.bf16.msra.mxu1 %v2286_v14  ;;  %2345 = vmatprep.subr.bf16.mxu0 %v2344_v17  ;;  %v2362_v14 = vpack.c.bf16 %v538_v8, %v534_v7  ;;  %v2396_v17 = vpack.c.bf16 %v481_v10, %v477_v9  ;;  %v579_v60 = vld [vmem:[#allocation11 + $0x5b8] sm:$0xff]  ;;  %v2412_v4 = vpack.c.bf16 %v513_v58, %v509_v57  ;;  %v578_v7 = vld [vmem:[#allocation11 + $0x5b0] sm:$0xff]  ;;  %v517_v8 = vld [vmem:[#allocation11 + $0x1c8] sm:$0xff] }
  0xb7   :  { %2289 = vmatprep.subr.bf16.mxu1 %v2288_v18  ;;  %v2364_v18 = vpack.c.bf16 %v547_v12, %v543_v11  ;;  %v521_v9 = vld [vmem:[#allocation11 + $0x1e8] sm:$0xff]  ;;  %v583_v10 = vld [vmem:[#allocation11 + $0x5d8] sm:$0xff]  ;;  %v470_v33 = vld [vmem:[#allocation11 + $0x50] sm:$0xff] }
  0xb8   :  { %v587_v11 = vld [vmem:[#allocation11 + $0x5f8] sm:$0xff]  ;;  %v474_v34 = vld [vmem:[#allocation11 + $0x70] sm:$0xff] }
  0xb9   :  { %2347 = vmatpush1.bf16.msra.mxu0 %v2346_v25  ;;  %v2366_v25 = vpack.c.bf16 %v546_v20, %v542_v19  ;;  %v586_v19 = vld [vmem:[#allocation11 + $0x5f0] sm:$0xff]  ;;  %v463_v20 = vld [vmem:[#allocation11 + $0x18] sm:$0xff] }
  0xba   :  { %2291 = vmatpush1.bf16.msra.mxu1 %v2290_v27  ;;  %2349 = vmatprep.subr.bf16.mxu0 %v2348_v30  ;;  %v484_v27 = vld [vmem:[#allocation11 + $0xc0] sm:$0xff]  ;;  %v2368_v30 = vpack.c.bf16 %v555_v24, %v551_v23  ;;  %v467_v21 = vld [vmem:[#allocation11 + $0x38] sm:$0xff]  ;;  %v486_v45 = vld [vmem:[#allocation11 + $0xd0] sm:$0xff] }
  0xbb   :  { %2293 = vmatprep.subr.bf16.mxu1 %v2292_v31  ;;  %v550_v31 = vld [vmem:[#allocation11 + $0x4d0] sm:$0xff]  ;;  %v2402_v37 = vpack.c.bf16 %v488_v28, %v484_v27  ;;  %v3066_v24 = vld [vmem:[#allocation5] sm:$0xff]  ;;  %v471_v28 = vld [vmem:[#allocation11 + $0x58] sm:$0xff] }
  0xbc   :  { %v466_v27 = vld [vmem:[#allocation11 + $0x30] sm:$0xff]  ;;  %v511_v58 = vld [vmem:[#allocation11 + $0x198] sm:$0xff] }
  0xbd   :  { %2351 = vmatpush1.bf16.msra.mxu0 %v2350_v38  ;;  %v2370_v38 = vpack.c.bf16 %v554_v32, %v550_v31  ;;  %v490_v46 = vld [vmem:[#allocation11 + $0xf0] sm:$0xff] }
  0xbe   :  { %2295 = vmatpush1.bf16.msra.mxu1 %v2294_v39  ;;  %2353 = vmatprep.subr.bf16.mxu0 %v2352_v42  ;;  %v492_v39 = vld [vmem:[#allocation11 + $0x100] sm:$0xff]  ;;  %v2372_v42 = vpack.c.bf16 %v563_v36, %v559_v35  ;;  %v479_v35 = vld [vmem:[#allocation11 + $0x98] sm:$0xff]  ;;  %v506_v57 = vld [vmem:[#allocation11 + $0x170] sm:$0xff] }
  0xbf   :  { %2297 = vmatprep.subr.bf16.mxu1 %v2296_v43  ;;  %v558_v43 = vld [vmem:[#allocation11 + $0x510] sm:$0xff]  ;;  %v2406_v49 = vpack.c.bf16 %v496_v40, %v492_v39  ;;  %v483_v36 = vld [vmem:[#allocation11 + $0xb8] sm:$0xff] }
  0xc0   :  { %v478_v39 = vld [vmem:[#allocation11 + $0x90] sm:$0xff] }
  0xc1   :  { %2355 = vmatpush1.bf16.msra.mxu0 %v2354_v50  ;;  %v2374_v50 = vpack.c.bf16 %v562_v44, %v558_v43  ;;  %v482_v40 = vld [vmem:[#allocation11 + $0xb0] sm:$0xff] }
  0xc2   :  { %2299 = vmatpush1.bf16.msra.mxu1 %v2298_v51  ;;  %2389 = vmatprep.subr.bf16.mxu0 %v2388_v54  ;;  %v500_v51 = vld [vmem:[#allocation11 + $0x140] sm:$0xff]  ;;  %v2376_v54 = vpack.c.bf16 %v571_v48, %v567_v47  ;;  %v2430_v43 = vpack.c.bf16 %v482_v40, %v478_v39  ;;  %v499_v47 = vld [vmem:[#allocation11 + $0x138] sm:$0xff]  ;;  %v2434_v48 = vpack.c.bf16 %v490_v46, %v486_v45 }
  0xc3   :  { %2357 = vmatprep.subr.bf16.mxu1 %v2356_v55  ;;  %v566_v55 = vld [vmem:[#allocation11 + $0x550] sm:$0xff]  ;;  %v2410_v61 = vpack.c.bf16 %v504_v52, %v500_v51  ;;  %v503_v52 = vld [vmem:[#allocation11 + $0x158] sm:$0xff] }
  0xc4   :  { %653 = vmatmul.mubr.f32.vlgmr.msra.gmra.mrb[2].mxu0 %v3060_v62  ;;  %v498_v51 = vld [vmem:[#allocation11 + $0x130] sm:$0xff] }
  0xc5   :  { %353 = vmatmul.mubr.f32.vlgmr.msra.gmra.mrb[2].mxu1 %v3054_v26  ;;  %2391 = vmatpush1.bf16.msra.mxu0 %v2390_v63  ;;  %v2398_v26 = vpack.c.bf16 %v480_v16, %v476_v15  ;;  %v2378_v63 = vpack.c.bf16 %v570_v56, %v566_v55  ;;  %v2416_v15 = vpack.c.bf16 %v521_v9, %v517_v8  ;;  %v502_v56 = vld [vmem:[#allocation11 + $0x150] sm:$0xff] }
  0xc6   :  { %2359 = vmatpush1.bf16.msra.mxu1 %v2358_v2  ;;  %2393 = vmatprep.subr.bf16.mxu0 %v2392_v5  ;;  %v508_v2 = vld [vmem:[#allocation11 + $0x180] sm:$0xff]  ;;  %v2380_v5 = vpack.c.bf16 %v579_v60, %v575_v59  ;;  %v2384_v16 = vpack.c.bf16 %v587_v11, %v583_v10  ;;  %v515_v59 = vld [vmem:[#allocation11 + $0x1b8] sm:$0xff]  ;;  %v2442_v60 = vpack.c.bf16 %v506_v57, %v502_v56  ;;  %v522_v8 = vld [vmem:[#allocation11 + $0x1f0] sm:$0xff] }
  0xc7   :  { %2361 = vmatprep.subr.bf16.mxu1 %v2360_v6  ;;  %794 = vmatprep.mubr.f32.mxu0 %v2890_v1  ;;  %v574_v6 = vld [vmem:[#allocation11 + $0x590] sm:$0xff]  ;;  %v2414_v12 = vpack.c.bf16 %v512_v3, %v508_v2  ;;  %v519_v3 = vld [vmem:[#allocation11 + $0x1d8] sm:$0xff] }
  0xc8   :  { %723 = vmatprep.mubr.f32.mxu1 %v2890_v1  ;;  %v514_v2 = vld [vmem:[#allocation11 + $0x1b0] sm:$0xff] }
  0xc9   :  { %2395 = vmatpush1.bf16.msra.mxu0 %v2394_v13  ;;  %v2382_v13 = vpack.c.bf16 %v578_v7, %v574_v6  ;;  %v518_v7 = vld [vmem:[#allocation11 + $0x1d0] sm:$0xff] }
  0xca   :  { %2363 = vmatpush1.bf16.msra.mxu1 %v2362_v14  ;;  %2397 = vmatprep.subr.bf16.mxu0 %v2396_v17  ;;  %v516_v14 = vld [vmem:[#allocation11 + $0x1c0] sm:$0xff]  ;;  %v2450_v9 = vpack.c.bf16 %v522_v8, %v518_v7  ;;  %v907_v8 = vld [vmem:[#allocation8 + $0x30] sm:$0xff] }
  0xcb   :  { %2365 = vmatprep.subr.bf16.mxu1 %v2364_v18  ;;  %v520_v17 = vld [vmem:[#allocation11 + $0x1e0] sm:$0xff]  ;;  %v582_v18 = vld [vmem:[#allocation11 + $0x5d0] sm:$0xff] }
  0xcc   :  { %v2418_v22 = vpack.c.bf16 %v520_v17, %v516_v14  ;;  %v2386_v23 = vpack.c.bf16 %v586_v19, %v582_v18 }
  0xcd   :  { %2399 = vmatpush1.bf16.msra.mxu0 %v2398_v26  ;;  %v2420_v26 = vpack.c.bf16 %v467_v21, %v463_v20 }
  0xce   :  { %2367 = vmatpush1.bf16.msra.mxu1 %v2366_v25  ;;  %2401 = vmatprep.subr.bf16.mxu0 %v2400_v29  ;;  %v462_v25 = vld [vmem:[#allocation11 + $0x10] sm:$0xff]  ;;  %v475_v29 = vld [vmem:[#allocation11 + $0x78] sm:$0xff] }
  0xcf   :  { %2369 = vmatprep.subr.bf16.mxu1 %v2368_v30  ;;  %v458_v30 = vmax.f32 %v3066_v24, 0.0  ;;  %v2422_v31 = vpack.c.bf16 %v466_v27, %v462_v25  ;;  %v2424_v32 = vpack.c.bf16 %v475_v29, %v471_v28 }
  0xd1   :  { %2403 = vmatpush1.bf16.msra.mxu0 %v2402_v37  ;;  %v2426_v37 = vpack.c.bf16 %v474_v34, %v470_v33 }
  0xd2   :  { %2371 = vmatpush1.bf16.msra.mxu1 %v2370_v38  ;;  %2405 = vmatprep.subr.bf16.mxu0 %v2404_v41  ;;  %v2428_v38 = vpack.c.bf16 %v483_v36, %v479_v35  ;;  %v487_v41 = vld [vmem:[#allocation11 + $0xd8] sm:$0xff] }
  0xd3   :  { %2373 = vmatprep.subr.bf16.mxu1 %v2372_v42  ;;  %v491_v42 = vld [vmem:[#allocation11 + $0xf8] sm:$0xff] }
  0xd4   :  { %v2432_v44 = vpack.c.bf16 %v491_v42, %v487_v41  ;;  %v123_v41 = vld [vmem:[#allocation10 + $0x10] sm:$0xff] }
  0xd5   :  { %2407 = vmatpush1.bf16.msra.mxu0 %v2406_v49 }
  0xd6   :  { %2375 = vmatpush1.bf16.msra.mxu1 %v2374_v50  ;;  %2409 = vmatprep.subr.bf16.mxu0 %v2408_v53  ;;  %v494_v50 = vld [vmem:[#allocation11 + $0x110] sm:$0xff]  ;;  %v507_v53 = vld [vmem:[#allocation11 + $0x178] sm:$0xff] }
  0xd7   :  { %2377 = vmatprep.subr.bf16.mxu1 %v2376_v54  ;;  %v2438_v54 = vpack.c.bf16 %v498_v51, %v494_v50  ;;  %v2440_v55 = vpack.c.bf16 %v507_v53, %v503_v52 }
  0xd9   :  { %2411 = vmatpush1.bf16.msra.mxu0 %v2410_v61  ;;  %v2444_v61 = vpack.c.bf16 %v515_v59, %v511_v58  ;;  %v904_v59 = vld [vmem:[#allocation8] sm:$0xff] }
  0xda   :  { %2379 = vmatpush1.bf16.msra.mxu1 %v2378_v63  ;;  %2413 = vmatprep.subr.bf16.mxu0 %v2412_v4  ;;  %v510_v63 = vld [vmem:[#allocation11 + $0x190] sm:$0xff]  ;;  %v523_v4 = vld [vmem:[#allocation11 + $0x1f8] sm:$0xff] }
  0xdb   :  { %2381 = vmatprep.subr.bf16.mxu1 %v2380_v5  ;;  %v2446_v5 = vpack.c.bf16 %v514_v2, %v510_v63  ;;  %v2448_v6 = vpack.c.bf16 %v523_v4, %v519_v3  ;;  %v906_v63 = vld [vmem:[#allocation8 + $0x20] sm:$0xff] }
  0xdd   :  { %2415 = vmatpush1.bf16.msra.mxu0 %v2414_v12  ;;  %v197_v12 = vlaneseq }
  0xde   :  { %2383 = vmatpush1.bf16.msra.mxu1 %v2382_v13  ;;  %2417 = vmatprep.subr.bf16.mxu0 %v2416_v15  ;;  %v195_v15 = vld [vmem:[#allocation13] ss:$8 sm:$0xf] }
  0xdf   :  { %2385 = vmatprep.subr.bf16.mxu1 %v2384_v16  ;;  %v3082_v13 = vshrl.u32 %v197_v12, 7 }
  0xe1   :  { %2419 = vmatpush1.bf16.msra.mxu0 %v2418_v22  ;;  %v3085_v14 = vsub.s32 0, %v3082_v13  ;;  %v3088_v16 = vsub.s32 1, %v3082_v13  ;;  %v3093_v27 = vsub.s32 2, %v3082_v13  ;;  %v211_v29 = vsub.s32 3, %v3082_v13 }
  0xe2   :  { %2387 = vmatpush1.bf16.msra.mxu1 %v2386_v23  ;;  %2487 = vmatprep.subr.bf16.mxu0 %v2889_v0 }
  0xe3   :  { %2421 = vmatprep.subr.bf16.mxu1 %v2420_v26  ;;  %v200_v17 = vrot.slane %v195_v15, %v3085_v14  ;;  %v204_v18 = vrot.slane %v195_v15, %v3088_v16  ;;  %v212_v34 = vrot.slane %v195_v15, %v211_v29 }
  0xe4   :  { %795 = vmatmul.mubr.f32.vlgmr.msra.gmra.mrb[2].mxu0 %v458_v30 }
  0xe5   :  { %724 = vmatmul.mubr.f32.vlgmr.msra.gmra.mrb[2].mxu1 %v3060_v62  ;;  %2163 = vmatprep.mubr.msk.f32.mxu0 %vm2891_vm0, %v2890_v1  ;;  %v495_v62 = vld [vmem:[#allocation11 + $0x118] sm:$0xff] }
  0xe6   :  { %2423 = vmatpush1.bf16.msra.mxu1 %v2422_v31  ;;  %865 = vmatprep.mubr.f32.mxu1 %v2890_v1  ;;  %v2436_v49 = vpack.c.bf16 %v499_v47, %v495_v62 }
  0xe7   :  { %2425 = vmatprep.subr.bf16.mxu1 %v2424_v32  ;;  %v208_v32 = vrot.slane %v195_v15, %v3093_v27  ;;  %v908_v15 = vld [vmem:[#allocation8 + $0x40] sm:$0xff] }
  0xea   :  { %2427 = vmatpush1.bf16.msra.mxu1 %v2426_v37 }
  0xeb   :  { %2429 = vmatprep.subr.bf16.mxu1 %v2428_v38 }
  0xee   :  { %2431 = vmatpush1.bf16.msra.mxu1 %v2430_v43 }
  0xef   :  { %2433 = vmatprep.subr.bf16.mxu1 %v2432_v44 }
  0xf2   :  { %2435 = vmatpush1.bf16.msra.mxu1 %v2434_v48  ;;  %v2892_v48 = vmov 1966171168  }
  0xf3   :  { %2437 = vmatprep.subr.bf16.mxu1 %v2436_v49  ;;  %v939_v49 = vunpack.c.l.s4 %v2892_v48 }
  0xf5   :  { %v940_v50 = vunpack.c.0.s8 %v939_v49  ;;  %v919_v49 = vld [vmem:[#allocation8 + $0xf0] sm:$0xff] }
  0xf6   :  { %2439 = vmatpush1.bf16.msra.mxu1 %v2438_v54 }
  0xf7   :  { %2441 = vmatprep.subr.bf16.mxu1 %v2440_v55  ;;  %v943_v52 = vsub.s32 %v940_v50, %v3082_v13 }
  0xfa   :  { %2443 = vmatpush1.bf16.msra.mxu1 %v2442_v60 }
  0xfb   :  { %2445 = vmatprep.subr.bf16.mxu1 %v2444_v61 }
  0xfe   :  { %2447 = vmatpush1.bf16.msra.mxu1 %v2446_v5 }
  0xff   :  { %2449 = vmatprep.subr.bf16.mxu1 %v2448_v6  ;;  %v905_v6 = vld [vmem:[#allocation8 + $0x10] sm:$0xff] }
 0x102   :  { %2451 = vmatpush1.bf16.msra.mxu1 %v2450_v9 }
 0x103   :  { %2452 = vmatprep.subr.bf16.mxu1 %v2889_v0 }
 0x105   :  { %866 = vmatmul.mubr.f32.vlgmr.msra.gmra.mrb[2].mxu1 %v458_v30 }
 0x106   :  { %2128 = vmatprep.mubr.msk.f32.mxu1 %vm2891_vm0, %v2890_v1 }
 0x178   :  { %v283_v10 = vpop.f32.mrb[0].mxu1 }
 0x179   :  { %v285_v11 = vpop.f32.mrb[1].mxu1  ;;  %v284_v19 = vadd.f32 %v283_v10, %v200_v17 }
 0x17a   :  { %v286_v20 = vadd.f32 %v285_v11, %v204_v18  ;;  %v909_v18 = vld [vmem:[#allocation8 + $0x50] sm:$0xff] }
 0x1b7   :  { %v796_v21 = vpop.f32.mrb[2].mxu0 }
 0x1b8   :  { %v2592_v22 = vadd.f32 %v796_v21, %v284_v19  ;;  %v798_v23 = vpop.f32.mrb[3].mxu0 }
 0x1b9   :  { %v2594_v24 = vadd.f32 %v798_v23, %v286_v20  ;;  %v912_v23 = vld [vmem:[#allocation8 + $0x80] sm:$0xff] }
 0x1ba   :  { %v2012_v25 = vmul.f32 -1.442695, %v2592_v22 }
 0x1bb   :  { %v2013_v26 = vmul.f32 -1.442695, %v2594_v24 }
 0x1bd   :  { %2631 = vpow2.f32 %v2013_v26  ;;  %v913_v26 = vld [vmem:[#allocation8 + $0x90] sm:$0xff] }
 0x1be   :  { %2633 = vpow2.f32 %v2012_v25 }
 0x1c7   :  { %v2632_v28 = vpop.eup %2631 }
 0x1c8   :  { %v2634_v30 = vpop.eup %2633  ;;  %v889_v31 = vadd.f32 1.0, %v2632_v28 }
 0x1c9   :  { %v883_v33 = vadd.f32 1.0, %v2634_v30 }
 0x1ca   :  { %2635 = vrcp.f32 %v889_v31  ;;  %v910_v31 = vld [vmem:[#allocation8 + $0x60] sm:$0xff] }
 0x1cb   :  { %2637 = vrcp.f32 %v883_v33  ;;  %v911_v33 = vld [vmem:[#allocation8 + $0x70] sm:$0xff] }
 0x1d4   :  { %v2636_v40 = vpop.eup %2635 }
 0x1d5   :  { %v2638_v42 = vpop.eup %2637  ;;  %v899_v44 = vmul.f32 %v2636_v40, %v123_v41 }
 0x1d8   :  { %v867_v35 = vpop.f32.mrb[2].mxu1 }
 0x1d9   :  { %v2595_v36 = vadd.f32 %v867_v35, %v208_v32  ;;  %v869_v37 = vpop.f32.mrb[3].mxu1 }
 0x1da   :  { %v2596_v38 = vadd.f32 %v869_v37, %v212_v34  ;;  %v914_v37 = vld [vmem:[#allocation8 + $0xa0] sm:$0xff] }
 0x1db   :  { %2639 = vtanh.f32 %v2595_v36 }
 0x1dc   :  { %v2014_v39 = vmul.f32 -1.442695, %v2596_v38 }
 0x1de   :  { %2641 = vpow2.f32 %v2014_v39  ;;  %v915_v39 = vld [vmem:[#allocation8 + $0xb0] sm:$0xff] }
 0x1e5   :  { %v2640_v43 = vpop.eup %2639 }
 0x1e6   :  { %v900_v45 = vmul.f32 %v2640_v43, %v2638_v42  ;;  %v916_v43 = vld [vmem:[#allocation8 + $0xc0] sm:$0xff] }
 0x1e8   :  { %v2642_v46 = vpop.eup %2641  ;;  %v901_v62 = vadd.f32 %v900_v45, %v899_v44  ;;  %v917_v45 = vld [vmem:[#allocation8 + $0xd0] sm:$0xff] }
 0x1e9   :  { %v896_v47 = vadd.f32 1.0, %v2642_v46 }
 0x1ea   :  { %2643 = vtanh.f32 %v901_v62 }
 0x1eb   :  { %2645 = vrcp.f32 %v896_v47  ;;  %v918_v47 = vld [vmem:[#allocation8 + $0xe0] sm:$0xff] }
 0x1f4   :  { %v2644_v51 = vpop.eup %2643 }
 0x1f5   :  { %v2646_v53 = vpop.eup %2645 }
 0x1f6   :  { %v3100_v54 = vmul.f32 %v2646_v53, %v2644_v51  ;;  %v1075_v53 = vld [vmem:[#allocation13 + $0xe0] sm:$0xff] }
 0x1f8   :  { %1978 = vst [vmem:[#allocation18] sm:$0xff] %v3100_v54  ;;  %v944_v55 = vrot.slane %v3100_v54, %v943_v52  ;;  %v937_v58 = vcombine.high %v3100_v54, %v3100_v54 }
 0x1fa   :  { %v960_v56 = vrot.slane %v944_v55, %v943_v52  ;;  %v952_v57 = vcombine.high %v944_v55, %v944_v55  ;;  %v951_v5 = vrot.slane %v937_v58, %v943_v52 }
 0x1fc   :  { %v989_v60 = vrot.slane %v960_v56, %v3085_v14  ;;  %v974_v61 = vrot.slane %v952_v57, %v943_v52  ;;  %v982_v4 = vcombine.high %v960_v56, %v960_v56  ;;  %v967_v11 = vrot.slane %v951_v5, %v943_v52 }
 0x1fd   :  { %v953_v22 = vcombine.high %v951_v5, %v951_v5 }
 0x1fe   :  { %v1026_v2 = vmul.f32 %v989_v60, %v904_v59  ;;  %v993_v3 = vrot.slane %v974_v61, %v3085_v14  ;;  %v1027_v9 = vmul.f32 %v989_v60, %v905_v6  ;;  %v997_v10 = vrot.slane %v982_v4, %v3085_v14 }
 0x1ff   :  { %v1005_v20 = vrot.slane %v967_v11, %v3085_v14  ;;  %v984_v21 = vcombine.high %v974_v61, %v974_v61  ;;  %v981_v30 = vrot.slane %v953_v22, %v943_v52  ;;  %v983_v36 = vcombine.high %v967_v11, %v967_v11  ;;  %v1074_v52 = vld [vmem:[#allocation13 + $0xc0] sm:$0xff] }
 0x200   :  { %1042 = vadd.xlane.f32.xlu0 %v1026_v2  ;;  %v1028_v7 = vmul.f32 %v993_v3, %v906_v63  ;;  %v1029_v17 = vmul.f32 %v993_v3, %v907_v8  ;;  %v1030_v19 = vmul.f32 %v997_v10, %v908_v15  ;;  %v1031_v24 = vmul.f32 %v997_v10, %v909_v18 }
 0x201   :  { %v1034_v25 = vmul.f32 %v1005_v20, %v912_v23  ;;  %v1001_v28 = vrot.slane %v984_v21, %v3085_v14  ;;  %v1035_v32 = vmul.f32 %v1005_v20, %v913_v26  ;;  %v1009_v35 = vrot.slane %v981_v30, %v3085_v14 }
 0x202   :  { %1046 = vadd.xlane.f32.xlu1 %v1028_v7  ;;  %v1013_v41 = vrot.slane %v983_v36, %v3085_v14  ;;  %v985_v42 = vcombine.high %v981_v30, %v981_v30  ;;  %v2453_v55 = vpack.c.bf16 %v1075_v53, %v1074_v52  ;;  %v1094_v63 = vand.u32 127, %v197_v12 }
 0x203   :  { %v1032_v34 = vmul.f32 %v1001_v28, %v910_v31  ;;  %v1033_v38 = vmul.f32 %v1001_v28, %v911_v33  ;;  %v1036_v40 = vmul.f32 %v1009_v35, %v914_v37  ;;  %v1037_v44 = vmul.f32 %v1009_v35, %v915_v39 }
 0x204   :  { %1044 = vadd.xlane.f32.xlu0 %v1027_v9  ;;  %v1038_v46 = vmul.f32 %v1013_v41, %v916_v43  ;;  %v1017_v62 = vrot.slane %v985_v42, %v3085_v14  ;;  %v1039_v48 = vmul.f32 %v1013_v41, %v917_v45  ;;  %2454 = vmatpush3.bf16.msra.mxu1 %v2453_v55  ;;  %v1099_v3 = vadd.s32 4294967288, %v1094_v63 }
 0x205   :  { %v1097_v8 = vsub.s32 %v1094_v63, %v3082_v13 }
 0x206   :  { %1048 = vadd.xlane.f32.xlu1 %v1029_v17  ;;  %v1040_v50 = vmul.f32 %v1017_v62, %v918_v47  ;;  %v1041_v51 = vmul.f32 %v1017_v62, %v919_v49  ;;  %v1102_v6 = vsub.s32 %v1099_v3, %v3082_v13 }
 0x208   :  { %1050 = vadd.xlane.f32.xlu0 %v1030_v19 }
 0x20a   :  { %1052 = vadd.xlane.f32.xlu1 %v1031_v24 }
 0x20c   :  { %1058 = vadd.xlane.f32.xlu0 %v1034_v25 }
 0x20e   :  { %1060 = vadd.xlane.f32.xlu1 %v1035_v32 }
 0x210   :  { %1054 = vadd.xlane.f32.xlu0 %v1032_v34 }
 0x212   :  { %1056 = vadd.xlane.f32.xlu1 %v1033_v38 }
 0x214   :  { %1062 = vadd.xlane.f32.xlu0 %v1036_v40 }
 0x216   :  { %1064 = vadd.xlane.f32.xlu1 %v1037_v44 }
 0x218   :  { %1066 = vadd.xlane.f32.xlu0 %v1038_v46 }
 0x21a   :  { %1068 = vadd.xlane.f32.xlu1 %v1039_v48 }
 0x21c   :  { %1070 = vadd.xlane.f32.xlu0 %v1040_v50  ;;  %v1076_v50 = vld [vmem:[#allocation13 + $0x100] ss:$0 sm:$0xff] }
 0x21e   :  { %1072 = vadd.xlane.f32.xlu1 %v1041_v51 }
 0x28d   :  { %v1043_v56 = vpop.xlane.xlu0 %1042 }
 0x28e   :  { %v1098_v21 = vrot.slane %v1043_v56, %v1097_v8 }
 0x28f   :  { %v1047_v57 = vpop.xlane.xlu1 %1046 }
 0x290   :  { %v1109_v15 = vrot.slane %v1047_v57, %v1097_v8 }
 0x291   :  { %v1045_v58 = vpop.xlane.xlu0 %1044 }
 0x292   :  { %v1103_v17 = vrot.slane %v1045_v58, %v1102_v6 }
 0x293   :  { %v1049_v59 = vpop.xlane.xlu1 %1048 }
 0x294   :  { %v1113_v9 = vrot.slane %v1049_v59, %v1102_v6  ;;  %v1105_v26 = vsel %vm1104_vm1, %v1103_v17, %v1098_v21  ;;  %v1314_v21 = vsub.s32 4, %v3082_v13 }
 0x295   :  { %v1051_v60 = vpop.xlane.xlu0 %1050 }
 0x296   :  { %v1118_v19 = vrot.slane %v1051_v60, %v1097_v8  ;;  %v1114_v12 = vsel %vm1104_vm1, %v1113_v9, %v1109_v15  ;;  %v1430_v15 = vld [vmem:[#allocation11 + $0x610] sm:$0xff] }
 0x297   :  { %v1053_v61 = vpop.xlane.xlu1 %1052  ;;  %v1170_v30 = vsel %vm1169_vm2, %v1114_v12, %v1105_v26  ;;  %v1435_v12 = vld [vmem:[#allocation11 + $0x648] sm:$0xff]  ;;  %v1437_v26 = vld [vmem:[#allocation11 + $0x660] sm:$0xff] }
 0x298   :  { %v1122_v10 = vrot.slane %v1053_v61, %v1102_v6 }
 0x299   :  { %v1059_v2 = vpop.xlane.xlu0 %1058 }
 0x29a   :  { %v1123_v23 = vsel %vm1104_vm1, %v1122_v10, %v1118_v19  ;;  %v1136_v36 = vrot.slane %v1059_v2, %v1097_v8  ;;  %v1428_v10 = vld [vmem:[#allocation11 + $0x600] sm:$0xff] }
 0x29b   :  { %v1061_v4 = vpop.xlane.xlu1 %1060  ;;  %v1172_v33 = vsel %vm1171_vm3, %v1123_v23, %v1170_v30  ;;  %v1439_v30 = vld [vmem:[#allocation11 + $0x670] sm:$0xff] }
 0x29c   :  { %v1140_v31 = vrot.slane %v1061_v4, %v1102_v6 }
 0x29d   :  { %v1055_v5 = vpop.xlane.xlu0 %1054 }
 0x29e   :  { %v1127_v22 = vrot.slane %v1055_v5, %v1097_v8  ;;  %v1141_v41 = vsel %vm1104_vm1, %v1140_v31, %v1136_v36  ;;  %v1440_v36 = vld [vmem:[#allocation11 + $0x680] sm:$0xff] }
 0x29f   :  { %v1057_v7 = vpop.xlane.xlu1 %1056 }
 0x2a0   :  { %v1131_v18 = vrot.slane %v1057_v7, %v1102_v6  ;;  %v1429_v7 = vld [vmem:[#allocation11 + $0x608] sm:$0xff] }
 0x2a1   :  { %v1063_v11 = vpop.xlane.xlu0 %1062 }
 0x2a2   :  { %v1132_v25 = vsel %vm1104_vm1, %v1131_v18, %v1127_v22  ;;  %v1145_v34 = vrot.slane %v1063_v11, %v1097_v8  ;;  %v1431_v11 = vld [vmem:[#allocation11 + $0x620] sm:$0xff]  ;;  %v1433_v18 = vld [vmem:[#allocation11 + $0x630] sm:$0xff]  ;;  %v1438_v22 = vld [vmem:[#allocation11 + $0x668] sm:$0xff] }
 0x2a3   :  { %v1065_v20 = vpop.xlane.xlu1 %1064  ;;  %v1174_v37 = vsel %vm1173_vm4, %v1132_v25, %v1172_v33  ;;  %v2457_v17 = vpack.c.bf16 %v1431_v11, %v1428_v10  ;;  %v2488_v19 = vpack.c.bf16 %v1433_v18, %v1430_v15  ;;  %v2459_v23 = vpack.c.bf16 %v1438_v22, %v1435_v12  ;;  %v1436_v25 = vld [vmem:[#allocation11 + $0x650] sm:$0xff]  ;;  %v1441_v33 = vld [vmem:[#allocation11 + $0x688] sm:$0xff] }
 0x2a4   :  { %v1149_v28 = vrot.slane %v1065_v20, %v1102_v6  ;;  %v1176_v44 = vsel %vm1175_vm5, %v1141_v41, %v1174_v37  ;;  %v2491_v31 = vpack.c.bf16 %v1439_v30, %v1436_v25  ;;  %v1443_v37 = vld [vmem:[#allocation11 + $0x6a0] sm:$0xff]  ;;  %v1463_v11 = vld [vmem:[#allocation11 + $0x770] sm:$0xff]  ;;  %v1468_v18 = vld [vmem:[#allocation11 + $0x7a8] sm:$0xff] }
 0x2a5   :  { %v1067_v24 = vpop.xlane.xlu0 %1066  ;;  %2489 = vmatpush3.bf16.msra.mxu0 %v2488_v19  ;;  %v1464_v19 = vld [vmem:[#allocation11 + $0x780] sm:$0xff]  ;;  %v1469_v22 = vld [vmem:[#allocation11 + $0x7b0] sm:$0xff] }
 0x2a6   :  { %v1154_v38 = vrot.slane %v1067_v24, %v1097_v8  ;;  %v1150_v40 = vsel %vm1104_vm1, %v1149_v28, %v1145_v34  ;;  %v1434_v24 = vld [vmem:[#allocation11 + $0x640] sm:$0xff]  ;;  %2490 = vmatprep.subr.bf16.mxu0 %v2889_v0  ;;  %v1444_v34 = vld [vmem:[#allocation11 + $0x6a8] sm:$0xff] }
 0x2a7   :  { %v1069_v32 = vpop.xlane.xlu1 %1068  ;;  %v1178_v62 = vsel %vm1177_vm6, %v1150_v40, %v1176_v44  ;;  %v2461_v28 = vpack.c.bf16 %v1437_v26, %v1434_v24  ;;  %v1445_v40 = vld [vmem:[#allocation11 + $0x6b0] sm:$0xff]  ;;  %v1447_v44 = vld [vmem:[#allocation11 + $0x6c8] sm:$0xff]  ;;  %v1473_v30 = vld [vmem:[#allocation11 + $0x7e0] sm:$0xff] }
 0x2a8   :  { %v1158_v35 = vrot.slane %v1069_v32, %v1102_v6  ;;  %v1325_v32 = vsub.s32 5, %v3082_v13  ;;  %v1471_v24 = vld [vmem:[#allocation11 + $0x7c8] sm:$0xff] }
 0x2a9   :  { %v1071_v39 = vpop.xlane.xlu0 %1070  ;;  %2492 = vmatpush3.bf16.msra.mxu0 %v2491_v31  ;;  %v1474_v26 = vld [vmem:[#allocation11 + $0x7e8] sm:$0xff]  ;;  %v1472_v31 = vld [vmem:[#allocation11 + $0x7d0] sm:$0xff] }
 0x2aa   :  { %v1159_v42 = vsel %vm1104_vm1, %v1158_v35, %v1154_v38  ;;  %v1163_v45 = vrot.slane %v1071_v39, %v1097_v8  ;;  %v1432_v8 = vld [vmem:[#allocation11 + $0x628] sm:$0xff]  ;;  %v2463_v35 = vpack.c.bf16 %v1444_v34, %v1441_v33  ;;  %v1442_v38 = vld [vmem:[#allocation11 + $0x690] sm:$0xff]  ;;  %v2465_v39 = vpack.c.bf16 %v1443_v37, %v1440_v36  ;;  %2493 = vmatprep.subr.bf16.mxu0 %v2889_v0 }
 0x2ab   :  { %v1073_v43 = vpop.xlane.xlu1 %1072  ;;  %v1180_v47 = vsel %vm1179_vm7, %v1159_v42, %v1178_v62  ;;  %v2455_v9 = vpack.c.bf16 %v1432_v8, %v1429_v7  ;;  %v2494_v41 = vpack.c.bf16 %v1445_v40, %v1442_v38  ;;  %v1446_v62 = vld [vmem:[#allocation11 + $0x6c0] sm:$0xff]  ;;  %v2483_v25 = vpack.c.bf16 %v1474_v26, %v1471_v24  ;;  %v1652_v33 = vld [vmem:[#allocation11 + $0x808] sm:$0xff] }
 0x2ac   :  { %v1167_v46 = vrot.slane %v1073_v43, %v1102_v6  ;;  %v1336_v43 = vsub.s32 6, %v3082_v13  ;;  %v1458_v7 = vld [vmem:[#allocation11 + $0x740] sm:$0xff]  ;;  %v1655_v34 = vld [vmem:[#allocation11 + $0x828] sm:$0xff] }
 0x2ad   :  { %2456 = vmatprep.subr.bf16.mxu1 %v2455_v9  ;;  %2495 = vmatpush3.bf16.msra.mxu0 %v2494_v41  ;;  %v1461_v8 = vld [vmem:[#allocation11 + $0x760] sm:$0xff]  ;;  %v1460_v9 = vld [vmem:[#allocation11 + $0x750] sm:$0xff]  ;;  %v2511_v36 = vpack.c.bf16 %v1655_v34, %v1652_v33 }
 0x2ae   :  { %v1168_v48 = vsel %vm1104_vm1, %v1167_v46, %v1163_v45  ;;  %v1450_v45 = vld [vmem:[#allocation11 + $0x6e8] sm:$0xff]  ;;  %2496 = vmatprep.subr.bf16.mxu0 %v2889_v0  ;;  %v2477_v10 = vpack.c.bf16 %v1461_v8, %v1458_v7  ;;  %v2503_v15 = vpack.c.bf16 %v1463_v11, %v1460_v9  ;;  %v923_v41 = vld [vmem:[#allocation8 + $0x38] sm:$0xff] }
 0x2af   :  { %v1182_v49 = vsel %vm1181_vm8, %v1168_v48, %v1180_v47  ;;  %v2467_v46 = vpack.c.bf16 %v1450_v45, %v1447_v44  ;;  %v1449_v47 = vld [vmem:[#allocation11 + $0x6e0] sm:$0xff]  ;;  %v1448_v48 = vld [vmem:[#allocation11 + $0x6d0] sm:$0xff] }
 0x2b0   :  { %2129 = vmatmul.mubr.msk.f32.vlgmr.msra.gmra.mrb[4].mxu1 %vm1183_vm9, %v1182_v49  ;;  %v2469_v49 = vpack.c.bf16 %v1449_v47, %v1446_v62  ;;  %v921_v44 = vld [vmem:[#allocation8 + $0x18] sm:$0xff]  ;;  %v920_v45 = vld [vmem:[#allocation8 + $0x8] sm:$0xff] }
 0x2b1   :  { %1574 = vmatprep.mubr.f32.mxu1 %v2890_v1  ;;  %2458 = vmatpush1.bf16.msra.mxu1 %v2457_v17  ;;  %v1465_v17 = vld [vmem:[#allocation11 + $0x788] sm:$0xff]  ;;  %v925_v62 = vld [vmem:[#allocation8 + $0x58] sm:$0xff]  ;;  %v924_v47 = vld [vmem:[#allocation8 + $0x48] sm:$0xff] }
 0x2b2   :  { %2460 = vmatprep.subr.bf16.mxu1 %v2459_v23 }
 0x2b5   :  { %2462 = vmatpush1.bf16.msra.mxu1 %v2461_v28  ;;  %v1470_v28 = vld [vmem:[#allocation11 + $0x7c0] sm:$0xff] }
 0x2b6   :  { %2464 = vmatprep.subr.bf16.mxu1 %v2463_v35 }
 0x2b9   :  { %2466 = vmatpush1.bf16.msra.mxu1 %v2465_v39 }
 0x2ba   :  { %2468 = vmatprep.subr.bf16.mxu1 %v2467_v46  ;;  %v922_v46 = vld [vmem:[#allocation8 + $0x28] sm:$0xff] }
 0x2bd   :  { %2470 = vmatpush1.bf16.msra.mxu1 %v2469_v49 }
 0x383   :  { %v1252_v51 = vpop.f32.mrb[4].mxu1 }
 0x384   :  { %v1253_v52 = vadd.f32 %v1252_v51, %v1076_v50  ;;  %v2130_v53 = vpop.f32.mrb[5].mxu1  ;;  %v1451_v50 = vld [vmem:[#allocation11 + $0x6f0] sm:$0xff] }
 0x385   :  { %v2497_v51 = vpack.c.bf16 %v1451_v50, %v1448_v48  ;;  %v1347_v53 = vsub.s32 7, %v3082_v13  ;;  %v1459_v13 = vld [vmem:[#allocation11 + $0x748] sm:$0xff] }
 0x386   :  { %v1256_v55 = vsel %vm1183_vm9, %v1253_v52, -inf }
 0x387   :  { %1257 = vmax.xlane.f32.xlu0 %v1256_v55  ;;  %v1453_v55 = vld [vmem:[#allocation11 + $0x708] sm:$0xff]  ;;  %2498 = vmatpush3.bf16.msra.mxu0 %v2497_v51 }
 0x388   :  { %2499 = vmatprep.subr.bf16.mxu0 %v2889_v0 }
 0x414   :  { %v1258_v56 = vpop.xlane.xlu0 %1257 }
 0x415   :  { %v1259_v57 = vsub.f32 %v1253_v52, %v1258_v56  ;;  %v1456_v56 = vld [vmem:[#allocation11 + $0x728] sm:$0xff] }
 0x417   :  { %v1260_v58 = vmul.f32 1.442695, %v1259_v57 }
 0x419   :  { %2647 = vpow2.f32 %v1260_v58  ;;  %v1452_v58 = vld [vmem:[#allocation11 + $0x700] sm:$0xff] }
 0x423   :  { %v2648_v59 = vpop.eup %2647 }
 0x424   :  { %v1262_v60 = vsel %vm1183_vm9, %v2648_v59, 0.0  ;;  %v1455_v59 = vld [vmem:[#allocation11 + $0x720] sm:$0xff] }
 0x425   :  { %1263 = vadd.xlane.f32.xlu1 %v1262_v60  ;;  %v1454_v60 = vld [vmem:[#allocation11 + $0x710] sm:$0xff] }
 0x4b2   :  { %v1264_v61 = vpop.xlane.xlu1 %1263 }
 0x4b3   :  { %2649 = vlog2.f32 %v1264_v61  ;;  %v2473_v61 = vpack.c.bf16 %v1455_v59, %v1452_v58  ;;  %v927_v58 = vld [vmem:[#allocation8 + $0x78] sm:$0xff] }
 0x4bd   :  { %v2650_v63 = vpop.eup %2649 }
 0x4be   :  { %v1266_v2 = vmul.f32 0.6931472, %v2650_v63  ;;  %v1457_v63 = vld [vmem:[#allocation11 + $0x730] sm:$0xff] }
 0x4c0   :  { %v3136_v3 = vsub.f32 %v1259_v57, %v1266_v2  ;;  %v2471_v57 = vpack.c.bf16 %v1456_v56, %v1453_v55  ;;  %v2500_v2 = vpack.c.bf16 %v1457_v63, %v1454_v60 }
 0x4c2   :  { %v1271_v4 = vrot.slane %v3136_v3, %v3085_v14  ;;  %v1282_v5 = vrot.slane %v3136_v3, %v3088_v16  ;;  %v1293_v6 = vrot.slane %v3136_v3, %v3093_v27  ;;  %v1304_v20 = vrot.slane %v3136_v3, %v211_v29  ;;  %2472 = vmatprep.subr.bf16.mxu1 %v2471_v57  ;;  %v926_v57 = vld [vmem:[#allocation8 + $0x68] sm:$0xff] }
 0x4c3   :  { %v1315_v29 = vrot.slane %v3136_v3, %v1314_v21  ;;  %v1326_v42 = vrot.slane %v3136_v3, %v1325_v32  ;;  %v1337_v52 = vrot.slane %v3136_v3, %v1336_v43  ;;  %2474 = vmatpush1.bf16.msra.mxu1 %v2473_v61  ;;  %2501 = vmatpush3.bf16.msra.mxu0 %v2500_v2  ;;  %v1466_v21 = vld [vmem:[#allocation11 + $0x790] sm:$0xff] }
 0x4c4   :  { %1277 = vbcast.lane.b32.xlu1 %v1271_v4, 264  ;;  %1273 = vbcast.lane.b32.xlu0 %v1271_v4, 256  ;;  %v1348_v4 = vrot.slane %v3136_v3, %v1347_v53  ;;  %v2479_v3 = vpack.c.bf16 %v1468_v18, %v1465_v17  ;;  %v2506_v23 = vpack.c.bf16 %v1469_v22, %v1466_v21  ;;  %v1475_v32 = vld [vmem:[#allocation11 + $0x7f0] sm:$0xff]  ;;  %v931_v21 = vld [vmem:[#allocation8 + $0xb8] sm:$0xff] }
 0x4c5   :  { %2502 = vmatprep.subr.bf16.mxu0 %v2889_v0  ;;  %v2509_v35 = vpack.c.bf16 %v1475_v32, %v1472_v31 }
 0x4c7   :  { %2504 = vmatpush3.bf16.msra.mxu0 %v2503_v15 }
 0x4c8   :  { %1284 = vbcast.lane.b32.xlu1 %v1282_v5, 256  ;;  %1295 = vbcast.lane.b32.xlu0 %v1293_v6, 256 }
 0x4c9   :  { %2505 = vmatprep.subr.bf16.mxu0 %v2889_v0 }
 0x4cb   :  { %2507 = vmatpush3.bf16.msra.mxu0 %v2506_v23 }
 0x4cc   :  { %1288 = vbcast.lane.b32.xlu1 %v1282_v5, 264  ;;  %1306 = vbcast.lane.b32.xlu0 %v1304_v20, 256  ;;  %v1462_v5 = vld [vmem:[#allocation11 + $0x768] sm:$0xff] }
 0x4cd   :  { %2508 = vmatprep.subr.bf16.mxu0 %v2889_v0 }
 0x4cf   :  { %2510 = vmatpush3.bf16.msra.mxu0 %v2509_v35 }
 0x4d0   :  { %1299 = vbcast.lane.b32.xlu1 %v1293_v6, 264  ;;  %1317 = vbcast.lane.b32.xlu0 %v1315_v29, 256  ;;  %v2475_v6 = vpack.c.bf16 %v1462_v5, %v1459_v13  ;;  %v928_v13 = vld [vmem:[#allocation8 + $0x88] sm:$0xff] }
 0x4d1   :  { %2543 = vmatprep.subr.bf16.mxu0 %v2889_v0 }
 0x4d2   :  { %2476 = vmatprep.subr.bf16.mxu1 %v2475_v6  ;;  %v929_v6 = vld [vmem:[#allocation8 + $0x98] sm:$0xff] }
 0x4d3   :  { %2478 = vmatpush1.bf16.msra.mxu1 %v2477_v10 }
 0x4d4   :  { %1310 = vbcast.lane.b32.xlu1 %v1304_v20, 264  ;;  %1328 = vbcast.lane.b32.xlu0 %v1326_v42, 256  ;;  %v1467_v20 = vld [vmem:[#allocation11 + $0x7a0] sm:$0xff] }
 0x4d5   :  { %v2481_v12 = vpack.c.bf16 %v1467_v20, %v1464_v19  ;;  %2480 = vmatprep.subr.bf16.mxu1 %v2479_v3  ;;  %v930_v19 = vld [vmem:[#allocation8 + $0xa8] sm:$0xff] }
 0x4d7   :  { %2482 = vmatpush1.bf16.msra.mxu1 %v2481_v12 }
 0x4d8   :  { %1321 = vbcast.lane.b32.xlu1 %v1315_v29, 264  ;;  %1339 = vbcast.lane.b32.xlu0 %v1337_v52, 256  ;;  %v2485_v29 = vpack.c.bf16 %v1473_v30, %v1470_v28  ;;  %v932_v30 = vld [vmem:[#allocation8 + $0xc8] sm:$0xff] }
 0x4d9   :  { %2484 = vmatprep.subr.bf16.mxu1 %v2483_v25 }
 0x4db   :  { %2486 = vmatpush1.bf16.msra.mxu1 %v2485_v29  ;;  %v933_v29 = vld [vmem:[#allocation8 + $0xd8] sm:$0xff] }
 0x4dc   :  { %1332 = vbcast.lane.b32.xlu1 %v1326_v42, 264  ;;  %1350 = vbcast.lane.b32.xlu0 %v1348_v4, 256 }
 0x4dd   :  { %2512 = vmatprep.subr.bf16.mxu1 %v2511_v36 }
 0x4e0   :  { %1343 = vbcast.lane.b32.xlu1 %v1337_v52, 264 }
 0x4e4   :  { %1354 = vbcast.lane.b32.xlu1 %v1348_v4, 264 }
 0x536   :  { %v1278_v37 = vpop.permute.xlu1 %1277  ;;  %v1274_v38 = vpop.permute.xlu0 %1273 }
 0x537   :  { %v1357_v49 = vmul.f32 %v1278_v37, %v921_v44  ;;  %v1356_v50 = vmul.f32 %v1274_v38, %v920_v45  ;;  %v935_v45 = vld [vmem:[#allocation8 + $0xf8] sm:$0xff] }
 0x539   :  { %v1372_v60 = vadd.f32 %v1357_v49, %v1356_v50 }
 0x53a   :  { %v1285_v39 = vpop.permute.xlu1 %1284  ;;  %v1296_v40 = vpop.permute.xlu0 %1295 }
 0x53b   :  { %v1358_v53 = vmul.f32 %v1285_v39, %v922_v46  ;;  %v1360_v56 = vmul.f32 %v1296_v40, %v924_v47  ;;  %v1373_v9 = vrot.slane %v1372_v60, 4 }
 0x53d   :  { %v1374_v12 = vadd.f32 %v1373_v9, %v1372_v60 }
 0x53e   :  { %v1289_v42 = vpop.permute.xlu1 %1288  ;;  %v1307_v43 = vpop.permute.xlu0 %1306 }
 0x53f   :  { %v1359_v48 = vmul.f32 %v1289_v42, %v923_v41  ;;  %v1362_v2 = vmul.f32 %v1307_v43, %v926_v57  ;;  %v1375_v34 = vrot.slane %v1374_v12, 2  ;;  %v934_v43 = vld [vmem:[#allocation8 + $0xe8] sm:$0xff] }
 0x541   :  { %v1379_v59 = vadd.f32 %v1359_v48, %v1358_v53  ;;  %v1376_v47 = vadd.f32 %v1375_v34, %v1374_v12 }
 0x542   :  { %v1300_v51 = vpop.permute.xlu1 %1299  ;;  %v1318_v52 = vpop.permute.xlu0 %1317 }
 0x543   :  { %v1361_v55 = vmul.f32 %v1300_v51, %v925_v62  ;;  %v1380_v7 = vrot.slane %v1379_v59, 4  ;;  %v1364_v15 = vmul.f32 %v1318_v52, %v928_v13 }
 0x545   :  { %v1386_v61 = vadd.f32 %v1361_v55, %v1360_v56  ;;  %v1381_v3 = vadd.f32 %v1380_v7, %v1379_v59 }
 0x546   :  { %v1311_v63 = vpop.permute.xlu1 %1310  ;;  %v1329_v5 = vpop.permute.xlu0 %1328 }
 0x547   :  { %v1363_v4 = vmul.f32 %v1311_v63, %v927_v58  ;;  %v1387_v10 = vrot.slane %v1386_v61, 4  ;;  %v1366_v28 = vmul.f32 %v1329_v5, %v930_v19  ;;  %v1382_v32 = vrot.slane %v1381_v3, 2 }
 0x549   :  { %v1393_v8 = vadd.f32 %v1363_v4, %v1362_v2  ;;  %v1388_v22 = vadd.f32 %v1387_v10, %v1386_v61  ;;  %v1383_v46 = vadd.f32 %v1382_v32, %v1381_v3  ;;  %v1377_v2 = vrot.slane %v1376_v47, 1  ;;  %v1661_v32 = vld [vmem:[#allocation11 + $0x868] sm:$0xff] }
 0x54a   :  { %v1322_v11 = vpop.permute.xlu1 %1321  ;;  %v1340_v23 = vpop.permute.xlu0 %1339 }
 0x54b   :  { %v1394_v17 = vrot.slane %v1393_v8, 4  ;;  %v1365_v18 = vmul.f32 %v1322_v11, %v929_v6  ;;  %v1389_v35 = vrot.slane %v1388_v22, 2  ;;  %v1368_v39 = vmul.f32 %v1340_v23, %v932_v30 }
 0x54c   :  { %v1384_v58 = vrot.slane %v1383_v46, 1 }
 0x54d   :  { %v1400_v20 = vadd.f32 %v1365_v18, %v1364_v15  ;;  %v1395_v26 = vadd.f32 %v1394_v17, %v1393_v8  ;;  %v1390_v48 = vadd.f32 %v1389_v35, %v1388_v22  ;;  %v1378_v15 = vadd.f32 %v1377_v2, %v1376_v47  ;;  %v1651_v22 = vld [vmem:[#allocation11 + $0x800] sm:$0xff]  ;;  %v1676_v2 = vld [vmem:[#allocation11 + $0x908] sm:$0xff] }
 0x54e   :  { %v1333_v24 = vpop.permute.xlu1 %1332  ;;  %v1351_v44 = vpop.permute.xlu0 %1350  ;;  %v1385_v7 = vadd.f32 %v1384_v58, %v1383_v46  ;;  %v1667_v46 = vld [vmem:[#allocation11 + $0x8a8] sm:$0xff]  ;;  %v1669_v58 = vld [vmem:[#allocation11 + $0x8c0] sm:$0xff] }
 0x54f   :  { %v1401_v25 = vrot.slane %v1400_v20, 4  ;;  %v1367_v31 = vmul.f32 %v1333_v24, %v931_v21  ;;  %v1396_v38 = vrot.slane %v1395_v26, 2  ;;  %v1370_v52 = vmul.f32 %v1351_v44, %v934_v43  ;;  %v1662_v43 = vld [vmem:[#allocation11 + $0x870] sm:$0xff] }
 0x550   :  { %v1391_v61 = vrot.slane %v1390_v48, 1 }
 0x551   :  { %v1402_v33 = vadd.f32 %v1401_v25, %v1400_v20  ;;  %v1407_v36 = vadd.f32 %v1367_v31, %v1366_v28  ;;  %v1397_v51 = vadd.f32 %v1396_v38, %v1395_v26  ;;  %v1502_v20 = vsel %vm1169_vm2, %v1385_v7, %v1378_v15  ;;  %v1654_v26 = vld [vmem:[#allocation11 + $0x820] sm:$0xff]  ;;  %v1653_v25 = vld [vmem:[#allocation11 + $0x810] sm:$0xff]  ;;  %v1685_v15 = vld [vmem:[#allocation11 + $0x968] sm:$0xff] }
 0x552   :  { %v1344_v37 = vpop.permute.xlu1 %1343  ;;  %v1392_v11 = vadd.f32 %v1391_v61, %v1390_v48  ;;  %v1656_v28 = vld [vmem:[#allocation11 + $0x830] sm:$0xff]  ;;  %v1657_v38 = vld [vmem:[#allocation11 + $0x840] sm:$0xff] }
 0x553   :  { %v1369_v40 = vmul.f32 %v1344_v37, %v933_v29  ;;  %v1403_v41 = vrot.slane %v1402_v33, 2  ;;  %v1408_v42 = vrot.slane %v1407_v36, 4  ;;  %v1398_v4 = vrot.slane %v1397_v51, 1  ;;  %v1658_v29 = vld [vmem:[#allocation11 + $0x848] sm:$0xff]  ;;  %v1663_v48 = vld [vmem:[#allocation11 + $0x880] sm:$0xff]  ;;  %v1671_v61 = vld [vmem:[#allocation11 + $0x8d0] sm:$0xff] }
 0x554   :  { %v1503_v23 = vsel %vm1171_vm3, %v1392_v11, %v1502_v20  ;;  %v2544_v37 = vpack.c.bf16 %v1656_v28, %v1653_v25  ;;  %v1682_v11 = vld [vmem:[#allocation11 + $0x948] sm:$0xff]  ;;  %v1684_v20 = vld [vmem:[#allocation11 + $0x960] sm:$0xff] }
 0x555   :  { %v1414_v62 = vadd.f32 %v1369_v40, %v1368_v39  ;;  %v1409_v49 = vadd.f32 %v1408_v42, %v1407_v36  ;;  %v1404_v56 = vadd.f32 %v1403_v41, %v1402_v33  ;;  %v1399_v17 = vadd.f32 %v1398_v4, %v1397_v51  ;;  %v1660_v41 = vld [vmem:[#allocation11 + $0x860] sm:$0xff]  ;;  %v1659_v42 = vld [vmem:[#allocation11 + $0x850] sm:$0xff]  ;;  %v1679_v4 = vld [vmem:[#allocation11 + $0x928] sm:$0xff] }
 0x556   :  { %v1355_v50 = vpop.permute.xlu1 %1354  ;;  %v2513_v36 = vpack.c.bf16 %v1654_v26, %v1651_v22  ;;  %v2515_v40 = vpack.c.bf16 %v1661_v32, %v1658_v29  ;;  %v2547_v47 = vpack.c.bf16 %v1662_v43, %v1659_v42  ;;  %v1665_v51 = vld [vmem:[#allocation11 + $0x890] sm:$0xff]  ;;  %v2527_v7 = vpack.c.bf16 %v1679_v4, %v1676_v2  ;;  %v1688_v22 = vld [vmem:[#allocation11 + $0x988] sm:$0xff]  ;;  %v1687_v25 = vld [vmem:[#allocation11 + $0x980] sm:$0xff] }
 0x557   :  { %v1415_v53 = vrot.slane %v1414_v62, 4  ;;  %v1371_v55 = vmul.f32 %v1355_v50, %v935_v45  ;;  %v1410_v57 = vrot.slane %v1409_v49, 2  ;;  %v1405_v6 = vrot.slane %v1404_v56, 1  ;;  %v1664_v45 = vld [vmem:[#allocation11 + $0x888] sm:$0xff]  ;;  %v1666_v50 = vld [vmem:[#allocation11 + $0x8a0] sm:$0xff]  ;;  %v1692_v29 = vld [vmem:[#allocation11 + $0x9b0] sm:$0xff] }
 0x558   :  { %v1504_v31 = vsel %vm1173_vm4, %v1399_v17, %v1503_v23  ;;  %v1691_v23 = vld [vmem:[#allocation11 + $0x9a8] sm:$0xff]  ;;  %v1879_v43 = vld [vmem:[#allocation14] sm:$0xff]  ;;  %v1894_v2 = vld [vmem:[#allocation14 + $0x78] sm:$0xff] }
 0x559   :  { %v1416_v59 = vadd.f32 %v1415_v53, %v1414_v62  ;;  %v1421_v60 = vadd.f32 %v1371_v55, %v1370_v52  ;;  %v1411_v63 = vadd.f32 %v1410_v57, %v1409_v49  ;;  %v1406_v19 = vadd.f32 %v1405_v6, %v1404_v56  ;;  %v1668_v52 = vld [vmem:[#allocation11 + $0x8b0] sm:$0xff]  ;;  %v1670_v53 = vld [vmem:[#allocation11 + $0x8c8] sm:$0xff]  ;;  %v1675_v6 = vld [vmem:[#allocation11 + $0x900] sm:$0xff] }
 0x55a   :  { %v2517_v62 = vpack.c.bf16 %v1660_v41, %v1657_v38  ;;  %v2519_v49 = vpack.c.bf16 %v1667_v46, %v1664_v45  ;;  %v1673_v55 = vld [vmem:[#allocation11 + $0x8e8] sm:$0xff]  ;;  %v2521_v56 = vpack.c.bf16 %v1666_v50, %v1663_v48  ;;  %v2550_v57 = vpack.c.bf16 %v1668_v52, %v1665_v51  ;;  %v1696_v38 = vld [vmem:[#allocation11 + $0x9e0] sm:$0xff]  ;;  %v1881_v46 = vld [vmem:[#allocation14 + $0x10] sm:$0xff] }
 0x55b   :  { %v1417_v13 = vrot.slane %v1416_v59, 2  ;;  %v1422_v5 = vrot.slane %v1421_v60, 4  ;;  %v1412_v8 = vrot.slane %v1411_v63, 1  ;;  %v1505_v33 = vsel %vm1175_vm5, %v1406_v19, %v1504_v31  ;;  %v1689_v31 = vld [vmem:[#allocation11 + $0x990] sm:$0xff]  ;;  %v1694_v32 = vld [vmem:[#allocation11 + $0x9c8] sm:$0xff]  ;;  %v1883_v48 = vld [vmem:[#allocation14 + $0x20] sm:$0xff] }
 0x55c   :  { %v2531_v19 = vpack.c.bf16 %v1685_v15, %v1682_v11  ;;  %v2535_v28 = vpack.c.bf16 %v1691_v23, %v1688_v22  ;;  %v1887_v52 = vld [vmem:[#allocation14 + $0x40] sm:$0xff] }
 0x55d   :  { %v1418_v9 = vadd.f32 %v1417_v13, %v1416_v59  ;;  %v1423_v10 = vadd.f32 %v1422_v5, %v1421_v60  ;;  %v1413_v21 = vadd.f32 %v1412_v8, %v1411_v63  ;;  %v2523_v59 = vpack.c.bf16 %v1673_v55, %v1670_v53  ;;  %v1672_v60 = vld [vmem:[#allocation11 + $0x8e0] sm:$0xff]  ;;  %v1674_v63 = vld [vmem:[#allocation11 + $0x8f0] sm:$0xff]  ;;  %v1888_v53 = vld [vmem:[#allocation14 + $0x48] sm:$0xff] }
 0x55e   :  { %v2525_v13 = vpack.c.bf16 %v1672_v60, %v1669_v58  ;;  %v2553_v5 = vpack.c.bf16 %v1674_v63, %v1671_v61  ;;  %v1678_v8 = vld [vmem:[#allocation11 + $0x920] sm:$0xff]  ;;  %v2580_v55 = vpack.c.bf16 %v1888_v53, %v1887_v52  ;;  %v1892_v60 = vld [vmem:[#allocation14 + $0x68] sm:$0xff]  ;;  %v1893_v63 = vld [vmem:[#allocation14 + $0x70] sm:$0xff] }
 0x55f   :  { %v1419_v18 = vrot.slane %v1418_v9, 1  ;;  %v1424_v3 = vrot.slane %v1423_v10, 2  ;;  %v1506_v35 = vsel %vm1177_vm6, %v1413_v21, %v1505_v33  ;;  %v2529_v17 = vpack.c.bf16 %v1678_v8, %v1675_v6  ;;  %v1683_v21 = vld [vmem:[#allocation11 + $0x950] sm:$0xff]  ;;  %v1697_v33 = vld [vmem:[#allocation11 + $0x9e8] sm:$0xff] }
 0x560   :  { %v2589_v4 = vpack.c.bf16 %v1894_v2, %v1893_v63  ;;  %v1700_v6 = vld [vmem:[#allocation13 + $0x80] ss:$8 sm:$0x7] }
 0x561   :  { %v1425_v12 = vadd.f32 %v1424_v3, %v1423_v10  ;;  %v1420_v24 = vadd.f32 %v1419_v18, %v1418_v9  ;;  %v1677_v9 = vld [vmem:[#allocation11 + $0x910] sm:$0xff]  ;;  %v1681_v3 = vld [vmem:[#allocation11 + $0x940] sm:$0xff]  ;;  %v1709_v11 = vrot.slane %v1700_v6, %v3088_v16 }
 0x562   :  { %v1680_v10 = vld [vmem:[#allocation11 + $0x930] sm:$0xff] }
 0x563   :  { %v1426_v30 = vrot.slane %v1425_v12, 1  ;;  %v1507_v39 = vsel %vm1179_vm7, %v1420_v24, %v1506_v35  ;;  %v2556_v18 = vpack.c.bf16 %v1680_v10, %v1677_v9  ;;  %v2533_v24 = vpack.c.bf16 %v1684_v20, %v1681_v3 }
 0x564   :  { %v2562_v35 = vpack.c.bf16 %v1692_v29, %v1689_v31  ;;  %v1705_v9 = vrot.slane %v1700_v6, %v3085_v14 }
 0x565   :  { %v1427_v34 = vadd.f32 %v1426_v30, %v1425_v12  ;;  %v1686_v12 = vld [vmem:[#allocation11 + $0x970] sm:$0xff]  ;;  %v1690_v30 = vld [vmem:[#allocation11 + $0x9a0] sm:$0xff] }
 0x566   :  { %v2559_v26 = vpack.c.bf16 %v1686_v12, %v1683_v21 }
 0x567   :  { %v1508_v44 = vsel %vm1181_vm8, %v1427_v34, %v1507_v39  ;;  %v2537_v34 = vpack.c.bf16 %v1690_v30, %v1687_v25  ;;  %v1695_v39 = vld [vmem:[#allocation11 + $0x9d0] sm:$0xff] }
 0x568   :  { %1575 = vmatmul.mubr.f32.vlgmr.msra.gmra.mrb[6].mxu1 %v1508_v44  ;;  %2164 = vmatmul.mubr.f32.vlgmr.msra.gmra.mrb[4].mxu0 %v1508_v44  ;;  %v1880_v44 = vld [vmem:[#allocation14 + $0x8] sm:$0xff] }
 0x569   :  { %2514 = vmatpush1.bf16.msra.mxu1 %v2513_v36  ;;  %2545 = vmatpush3.bf16.msra.mxu0 %v2544_v37  ;;  %v1693_v36 = vld [vmem:[#allocation11 + $0x9c0] sm:$0xff]  ;;  %v2539_v37 = vpack.c.bf16 %v1697_v33, %v1694_v32  ;;  %v2568_v45 = vpack.c.bf16 %v1880_v44, %v1879_v43 }
 0x56a   :  { %2516 = vmatprep.subr.bf16.mxu1 %v2515_v40  ;;  %2546 = vmatprep.subr.bf16.mxu0 %v2889_v0  ;;  %v1698_v40 = vld [vmem:[#allocation11 + $0x9f0] sm:$0xff]  ;;  %v2541_v41 = vpack.c.bf16 %v1696_v38, %v1693_v36 }
 0x56b   :  { %1781 = vmatprep.mubr.f32.mxu1 %v2890_v1  ;;  %2198 = vmatprep.mubr.msk.f32.mxu0 %vm2891_vm0, %v2890_v1  ;;  %v2565_v42 = vpack.c.bf16 %v1698_v40, %v1695_v39  ;;  %v2011_v40 = vld [vmem:[#allocation16] ss:$0 sm:$0xff] }
 0x56d   :  { %2518 = vmatpush1.bf16.msra.mxu1 %v2517_v62  ;;  %2548 = vmatpush3.bf16.msra.mxu0 %v2547_v47  ;;  %v1882_v62 = vld [vmem:[#allocation14 + $0x18] sm:$0xff] }
 0x56e   :  { %2520 = vmatprep.subr.bf16.mxu1 %v2519_v49  ;;  %2549 = vmatprep.subr.bf16.mxu0 %v2889_v0  ;;  %v2571_v47 = vpack.c.bf16 %v1882_v62, %v1881_v46  ;;  %v1884_v49 = vld [vmem:[#allocation14 + $0x28] sm:$0xff] }
 0x56f   :  { %v2574_v50 = vpack.c.bf16 %v1884_v49, %v1883_v48 }
 0x571   :  { %2522 = vmatpush1.bf16.msra.mxu1 %v2521_v56  ;;  %2551 = vmatpush3.bf16.msra.mxu0 %v2550_v57  ;;  %v1889_v56 = vld [vmem:[#allocation14 + $0x50] sm:$0xff]  ;;  %v1890_v57 = vld [vmem:[#allocation14 + $0x58] sm:$0xff] }
 0x572   :  { %2524 = vmatprep.subr.bf16.mxu1 %v2523_v59  ;;  %2552 = vmatprep.subr.bf16.mxu0 %v2889_v0  ;;  %v2583_v58 = vpack.c.bf16 %v1890_v57, %v1889_v56  ;;  %v1891_v59 = vld [vmem:[#allocation14 + $0x60] sm:$0xff] }
 0x573   :  { %v2586_v61 = vpack.c.bf16 %v1892_v60, %v1891_v59 }
 0x575   :  { %2526 = vmatpush1.bf16.msra.mxu1 %v2525_v13  ;;  %2554 = vmatpush3.bf16.msra.mxu0 %v2553_v5 }
 0x576   :  { %2528 = vmatprep.subr.bf16.mxu1 %v2527_v7  ;;  %2555 = vmatprep.subr.bf16.mxu0 %v2889_v0  ;;  %v1477_v7 = vld [vmem:[#allocation13 + $0x40] ss:$8 sm:$0x7] }
 0x577   :  { %v1482_v8 = vrot.slane %v1477_v7, %v3085_v14  ;;  %v1486_v10 = vrot.slane %v1477_v7, %v3088_v16  ;;  %v1490_v16 = vrot.slane %v1477_v7, %v3093_v27 }
 0x579   :  { %2530 = vmatpush1.bf16.msra.mxu1 %v2529_v17  ;;  %2557 = vmatpush3.bf16.msra.mxu0 %v2556_v18  ;;  %v2598_v15 = vadd.f32 %v1705_v9, %v1482_v8  ;;  %v2600_v3 = vadd.f32 %v1709_v11, %v1486_v10 }
 0x57a   :  { %2532 = vmatprep.subr.bf16.mxu1 %v2531_v19  ;;  %2558 = vmatprep.subr.bf16.mxu0 %v2889_v0 }
 0x57d   :  { %2534 = vmatpush1.bf16.msra.mxu1 %v2533_v24  ;;  %2560 = vmatpush3.bf16.msra.mxu0 %v2559_v26  ;;  %v1713_v26 = vrot.slane %v1700_v6, %v3093_v27 }
 0x57e   :  { %2536 = vmatprep.subr.bf16.mxu1 %v2535_v28  ;;  %2561 = vmatprep.subr.bf16.mxu0 %v2889_v0 }
 0x581   :  { %2538 = vmatpush1.bf16.msra.mxu1 %v2537_v34  ;;  %2563 = vmatpush3.bf16.msra.mxu0 %v2562_v35 }
 0x582   :  { %2540 = vmatprep.subr.bf16.mxu1 %v2539_v37  ;;  %2564 = vmatprep.subr.bf16.mxu0 %v2889_v0  ;;  %v2665_v37 = vld [vmem:[#allocation18] sm:$0xff] }
 0x585   :  { %2542 = vmatpush1.bf16.msra.mxu1 %v2541_v41  ;;  %2566 = vmatpush3.bf16.msra.mxu0 %v2565_v42 }
 0x586   :  { %2567 = vmatprep.subr.bf16.mxu0 %v2889_v0 }
 0x588   :  { %1782 = vmatmul.mubr.f32.vlgmr.msra.gmra.mrb[6].mxu1 %v3100_v54  ;;  %2199 = vmatmul.mubr.f32.vlgmr.msra.gmra.mrb[6].mxu0 %v3100_v54  ;;  %v1885_v54 = vld [vmem:[#allocation14 + $0x30] sm:$0xff] }
 0x589   :  { %2233 = vmatprep.mubr.msk.f32.mxu0 %vm2891_vm0, %v2890_v1  ;;  %2569 = vmatpush3.bf16.msra.mxu0 %v2568_v45  ;;  %v1886_v1 = vld [vmem:[#allocation14 + $0x38] sm:$0xff] }
 0x58a   :  { %2570 = vmatprep.subr.bf16.mxu0 %v2889_v0  ;;  %v2577_v51 = vpack.c.bf16 %v1886_v1, %v1885_v54 }
 0x58d   :  { %2572 = vmatpush3.bf16.msra.mxu0 %v2571_v47 }
 0x58e   :  { %2573 = vmatprep.subr.bf16.mxu0 %v2889_v0 }
 0x591   :  { %2575 = vmatpush3.bf16.msra.mxu0 %v2574_v50 }
 0x592   :  { %2576 = vmatprep.subr.bf16.mxu0 %v2889_v0 }
 0x595   :  { %2578 = vmatpush3.bf16.msra.mxu0 %v2577_v51 }
 0x596   :  { %2579 = vmatprep.subr.bf16.mxu0 %v2889_v0 }
 0x599   :  { %2581 = vmatpush3.bf16.msra.mxu0 %v2580_v55 }
 0x59a   :  { %2582 = vmatprep.subr.bf16.mxu0 %v2889_v0 }
 0x59d   :  { %2584 = vmatpush3.bf16.msra.mxu0 %v2583_v58 }
 0x59e   :  { %2585 = vmatprep.subr.bf16.mxu0 %v2889_v0 }
 0x5a1   :  { %2587 = vmatpush3.bf16.msra.mxu0 %v2586_v61 }
 0x5a2   :  { %2588 = vmatprep.subr.bf16.mxu0 %v2889_v0 }
 0x5a5   :  { %2590 = vmatpush3.bf16.msra.mxu0 %v2589_v4 }
 0x63b   :  { %v1647_v13 = vpop.f32.mrb[4].mxu0 }
 0x63c   :  { %v2165_v5 = vpop.f32.mrb[5].mxu0  ;;  %v1648_v31 = vadd.f32 %v1647_v13, %v1490_v16 }
 0x65b   :  { %v1783_v17 = vpop.f32.mrb[6].mxu1  ;;  %v1854_v18 = vpop.f32.mrb[6].mxu0 }
 0x65c   :  { %v2599_v19 = vadd.f32 %v2598_v15, %v1783_v17  ;;  %v1785_v20 = vpop.f32.mrb[7].mxu1  ;;  %v2200_v0 = vpop.f32.mrb[7].mxu0  ;;  %v1855_v28 = vadd.f32 %v1854_v18, %v1713_v26 }
 0x65d   :  { %v2601_v12 = vadd.f32 %v2600_v3, %v1785_v20 }
 0x65e   :  { %v2016_v21 = vmul.f32 -1.442695, %v2599_v19 }
 0x65f   :  { %v2017_v22 = vmul.f32 -1.442695, %v2601_v12 }
 0x660   :  { %2651 = vpow2.f32 %v2016_v21 }
 0x661   :  { %2653 = vpow2.f32 %v2017_v22 }
 0x66a   :  { %v2652_v23 = vpop.eup %2651 }
 0x66b   :  { %v1862_v24 = vadd.f32 1.0, %v2652_v23  ;;  %v2654_v14 = vpop.eup %2653 }
 0x66c   :  { %v1869_v25 = vadd.f32 1.0, %v2654_v14 }
 0x66d   :  { %2655 = vrcp.f32 %v1862_v24 }
 0x66e   :  { %2657 = vrcp.f32 %v1869_v25 }
 0x677   :  { %v2656_v30 = vpop.eup %2655 }
 0x678   :  { %v1872_v29 = vmul.f32 %v2656_v30, %v1855_v28  ;;  %v2658_v33 = vpop.eup %2657 }
 0x679   :  { %v1875_v34 = vsub.f32 1.0, %v2658_v33  ;;  %v1877_v38 = vmul.f32 %v2665_v37, %v2658_v33 }
 0x67a   :  { %v1873_v32 = vadd.f32 %v1872_v29, %v1648_v31 }
 0x67c   :  { %2659 = vtanh.f32 %v1873_v32 }
 0x686   :  { %v2660_v35 = vpop.eup %2659 }
 0x687   :  { %v1876_v36 = vmul.f32 %v2660_v35, %v1875_v34 }
 0x689   :  { %v1878_v39 = vadd.f32 %v1877_v38, %v1876_v36 }
 0x68b   :  { %2234 = vmatmul.mubr.f32.vlgmr.msra.gmra.mrb[0].mxu0 %v1878_v39 }
 0x75e   :  { %v1962_v41 = vpop.f32.mrb[0].mxu0 }
 0x75f   :  { %v2597_v42 = vadd.f32 %v2011_v40, %v1962_v41  ;;  %v2235_v27 = vpop.f32.mrb[1].mxu0 }
 0x761   :  { %1966 = vmax.xlane.f32.xlu0 %v2597_v42 }
 0x7ee   :  { %v1967_v43 = vpop.xlane.xlu0 %1966 }
 0x7ef   :  { %v1968_v44 = vsub.f32 %v2597_v42, %v1967_v43 }
 0x7f1   :  { %v1969_v45 = vmul.f32 1.442695, %v1968_v44 }
 0x7f3   :  { %2661 = vpow2.f32 %v1969_v45 }
 0x7fd   :  { %v2662_v46 = vpop.eup %2661 }
 0x7fe   :  { %1971 = vadd.xlane.f32.xlu1 %v2662_v46 }
 0x7ff   :  { %2831 = shalt.err (!%p2828_p4)
}
 0x800   :  { %s2832_s26 = scalar_lea.hbm %s3230_s8, 128 }
 0x801   :  { %p2833_p5 = scmp.ne.s32.totalorder %s3230_s8, %s2832_s26  ;;  %p2836_p6 = scmp.lt.u32.totalorder %s2832_s26, %s3230_s8 }
 0x803   :  { %p2838_p7 = pnand %p2836_p6, %p2833_p5 }
 0x805   :  { %2841 = shalt.err (!%p2838_p7)
}
 0x806   :  { %1998 = dma.vmem_to_hbm [thread:$0]  %s1996_s17, 128, %s3230_s8, [#allocation19]  }
 0x807   :  { %s2894_s5 = smov [#allocation17]  }
 0x808   :  { %s1985_s11 = sshll.u32 %s2894_s5, 4  ;;  %s1986_s11 = int_to_ptr.vmem [resolvable:$true] %s1985_s11 }
 0x809   :  { %s2842_s2 = scalar_lea.vmem %s1986_s11, 128  ;;  %p2847_p9 = scmp.lt.s32.totalorder %s1986_s11, %s1986_s11 }
 0x80a   :  { %p2843_p8 = scmp.ne.s32.totalorder %s1986_s11, %s2842_s2  ;;  %p2848_p10 = scmp.lt.s32.totalorder %s2842_s2, %s2842_s2 }
 0x80c   :  { %p2849_p11 = por %p2848_p10, %p2847_p9 }
 0x80e   :  { %p2850_p12 = pnand %p2849_p11, %p2843_p8 }
 0x88b   :  { %v1972_v62 = vpop.xlane.xlu1 %1971 }
 0x88c   :  { %2663 = vlog2.f32 %v1972_v62 }
 0x896   :  { %v2664_v47 = vpop.eup %2663 }
 0x897   :  { %v1974_v48 = vmul.f32 0.6931472, %v2664_v47 }
 0x899   :  { %v1975_v49 = vsub.f32 %v1968_v44, %v1974_v48 }
 0x89b   :  { %1976 = vst [vmem:[#allocation17] sm:$0xff] %v1975_v49 }
 0x89c   :  { %2853 = shalt.err (!%p2850_p12)
}
 0x89d   :  { %s2854_s8 = scalar_lea.hbm %s3229_s7, 128 }
 0x89e   :  { %p2855_p13 = scmp.ne.s32.totalorder %s3229_s7, %s2854_s8  ;;  %p2858_p0 = scmp.lt.u32.totalorder %s2854_s8, %s3229_s7 }
 0x8a0   :  { %p2860_p1 = pnand %p2858_p0, %p2855_p13 }
 0x8a2   :  { %2863 = shalt.err (!%p2860_p1)
}
 0x8a3   :  { %1988 = dma.vmem_to_hbm [thread:$0]  %s1986_s11, 128, %s3229_s7, [#allocation7]  }
 0x8a4   :  { %2872 = dma.done.wait [#allocation7], 128  }
 0x8a5   :  { %2873 = vsyncadd [#allocation7], 4294967168 }
 0x8a6   :  { %2874 = dma.done.wait [#allocation19], 128  }
 0x8a7   :  { %2875 = vsyncadd [#allocation19], 4294967168 }
 0x8a8   :  { %2005 = vsyncpa [#allocation6], 1 }
 0x8a9   :  { %2006 = vsyncpa [#allocation9], 1 }
 0x8aa   :  { %2007 = vsyncpa [#allocation12], 1 }
 0x8ab   :  { %2008 = vsyncpa [#allocation15], 1 }
 0x8ac   :  { %2009 = vsyncpa [#allocation7], 1 }
 0x8ad   :  { %2010 = vsyncpa [#allocation19], 1 }

</bundles_post_ra>
